<compile_context>
chip_gen: v5e
topology: v5e:2x2
jax: 0.10.0
libtpu: 0.0.40
codegen_flags: <defaults>
</compile_context>

<pallas_src>
import jax
import jax.numpy as jnp
import numpy as np
from jax.experimental import pallas as pl
from jax.experimental.pallas import tpu as pltpu


def ntn_kernel(obs_ref, thr_ref, w_ref, tab_ref, out_ref, bits_ref):
    nt = pl.program_id(1)  # node-tile (reduction) axis, innermost

    obs_dim, tb = obs_ref.shape
    input_dim = thr_ref.shape[0]
    tn = w_ref.shape[0]                       # nodes in this tile
    out_dim, flat_cols = tab_ref.shape        # flat_cols = tn * 2**T
    n_rows = flat_cols // tn                  # 2**tuple_size
    res = input_dim // obs_dim

    @pl.when(nt == 0)
    def _init():
        # Thermometer encoding, hoisted: computed ONCE per batch tile (not per node step).
        # obs_rep[f*res + r, b] = obs[f, b] via a tiny 0/1 repeat matrix (K = obs_dim), then
        # bit = (value > threshold) on the VPU.  Stored to a persistent bf16 scratch.
        j_i = jax.lax.broadcasted_iota(jnp.int32, (input_dim, obs_dim), 0)
        f_i = jax.lax.broadcasted_iota(jnp.int32, (input_dim, obs_dim), 1)
        rep = jnp.logical_and(j_i >= f_i * res, j_i < (f_i + 1) * res).astype(jnp.float32)
        obs_rep = jnp.dot(rep, obs_ref[...], preferred_element_type=jnp.float32)  # (input_dim, tb)
        bits_ref[...] = (obs_rep > thr_ref[...]).astype(jnp.bfloat16)
        out_ref[...] = jnp.zeros_like(out_ref)

    # Keys for this node tile: permutation + conv1d(exp2, stride=T) folded into w_ref.
    # bf16 x bf16 with f32 accumulation is exact (bits are 0/1, weights are powers of two,
    # keys < 2**24 per the tuple_size guard).
    keys_t = jnp.dot(w_ref[...], bits_ref[...], preferred_element_type=jnp.float32)  # (tn, tb)
    keys_i = keys_t.astype(jnp.int32)                                                # exact ints

    # EmbeddingBag(mode='sum') as ONE flattened one-hot matmul over K = tn * 2**T.
    # One-hot built directly by a broadcast compare (VPU only); the (tn, 2**T, tb) -> (K, tb)
    # reshape merges leading dims with the lane dim unchanged (layout-free).
    row_ids = jax.lax.broadcasted_iota(jnp.int32, (n_rows, tb), 0)
    onehot_t = (keys_i[:, None, :] == row_ids[None, :, :]).astype(jnp.bfloat16)
    onehot_t = onehot_t.reshape(tn * n_rows, tb)                                     # (K, tb)

    # (out_dim, K) bf16 @ (K, tb) bf16 -> f32, accumulated into the resident output block.
    # TODO(synk): for tuple_size >= ~14 replace this one-hot matmul with a manual DMA gather of
    #             only the indexed rows (table in pl.ANY/HBM, double-buffered make_async_copy).
    out_ref[...] += jnp.dot(tab_ref[...], onehot_t, preferred_element_type=jnp.float32)


def _batch_tile(B):
    """(batch tile, padded batch).  Large B is padded to a multiple of 128 so the lane dim of
    bits/one-hot/output blocks is dense; small B uses the full (unpadded) batch as one tile."""
    if B <= 128:
        return B, B
    tb = 128
    return tb, -(-B // tb) * tb


def _node_tile(n_nodes, n_rows, out_dim, tb, input_dim, budget=40 * 1024 * 1024):
    """Prefer the whole table resident in VMEM (tn = n_nodes -> DMA'd once for the whole grid);
    otherwise a sublane-aligned node tile.  Budget math includes lane/sublane padding of the
    bf16 table block, the per-step one-hot temporaries, and the persistent scratches, so it is
    safe on v7x's 64 MiB VMEM as well as v5e/v6e."""
    lane = lambda n: -(-n // 128) * 128
    sub = lambda n, t: -(-n // t) * t
    tb_l = lane(tb)

    def est(tn):
        tab = sub(out_dim, 16) * lane(tn * n_rows) * 2 * 2      # bf16 table block, 2x buffered
        onehot = tn * sub(n_rows, 16) * tb_l * (4 + 2)          # int32 compare temps + bf16 onehot
        bits = sub(input_dim, 16) * tb_l * 2                    # bf16 bits scratch (persistent)
        keyw = sub(max(tn, 16), 16) * lane(input_dim) * 2 * 2   # bf16 key-weight block, 2x buffered
        outb = sub(out_dim, 8) * tb_l * 4 * 2                   # f32 output block
        return tab + onehot + bits + keyw + outb

    if est(n_nodes) <= budget:
        return n_nodes
    for tn in sorted((d for d in range(8, n_nodes, 8) if n_nodes % d == 0), reverse=True):
        if (tn * n_rows) % 128 == 0 and est(tn) <= budget:
            return tn
    # TODO(synk): for very large 2**tuple_size the one-hot path cannot fit VMEM; needs a manual
    #             DMA-gather kernel (table in HBM, keys in SMEM) instead.
    raise NotImplementedError("table / one-hot blocks do not fit the VMEM budget")


def ntn_apply(obs, thresholds, w_keys, table, tuple_size):
    """obs: (B, obs_dim) f32; thresholds: (res,) f32; w_keys: (input_dim, n_nodes);
    table: (n_nodes, 2**T, out_dim). Returns (B, out_dim) f32.
    Table is streamed as bf16 (exact per-element round; f32 accumulation)."""
    assert tuple_size <= 24, "f32 key accumulation is only exact for tuple_size <= 24"
    B, obs_dim = obs.shape
    res = int(thresholds.shape[0])
    input_dim = obs_dim * res
    n_nodes, n_rows, out_dim = table.shape
    assert n_rows == 2 ** tuple_size
    assert w_keys.shape == (input_dim, n_nodes)

    # Transposed, lane-dense parameter layouts (tiny host-side glue, no B-scaled HBM blowup).
    obs_t = obs.astype(jnp.float32).T                                         # (obs_dim, B)
    thr_t = jnp.tile(thresholds.astype(jnp.float32), obs_dim)[:, None]        # (input_dim, 1)
    wk_t = w_keys.astype(jnp.bfloat16).T                                      # (n_nodes, input_dim)
    tab_t = table.reshape(n_nodes * n_rows, out_dim).astype(jnp.bfloat16).T   # (out_dim, K_total)

    tb, b_pad = _batch_tile(B)
    if b_pad != B:
        obs_t = jnp.pad(obs_t, ((0, 0), (0, b_pad - B)))
    tn = _node_tile(n_nodes, n_rows, out_dim, tb, input_dim)
    assert b_pad % tb == 0 and n_nodes % tn == 0
    grid = (b_pad // tb, n_nodes // tn)
    # TODO(synk): on v7x with a single batch tile (B <= 128) the node reduction could be split
    #             across the two TensorCores with per-core partial accumulators + final add.

    out_t = pl.pallas_call(
        ntn_kernel,
        out_shape=jax.ShapeDtypeStruct((out_dim, b_pad), jnp.float32),
        grid_spec=pltpu.PrefetchScalarGridSpec(
            num_scalar_prefetch=0,
            grid=grid,
            in_specs=[
                pl.BlockSpec((obs_dim, tb), lambda b, n: (0, b)),            # obs (transposed)
                pl.BlockSpec((input_dim, 1), lambda b, n: (0, 0)),           # thresholds (resident)
                pl.BlockSpec((tn, input_dim), lambda b, n: (n, 0)),          # key weights (node tile)
                pl.BlockSpec((out_dim, tn * n_rows), lambda b, n: (0, n)),   # bf16 table (resident
                                                                             #  when tn == n_nodes)
            ],
            out_specs=pl.BlockSpec((out_dim, tb), lambda b, n: (0, b)),      # accumulator-resident
            scratch_shapes=[pltpu.VMEM((input_dim, tb), jnp.bfloat16)],      # thermometer bits
        ),
        compiler_params=pltpu.CompilerParams(
            dimension_semantics=("parallel", "arbitrary"),   # batch across cores, nodes = reduction
            vmem_limit_bytes=48 * 1024 * 1024,               # safe on v7x (64 MiB) and v5e/v6e
        ),
    )(obs_t, thr_t, wk_t, tab_t)

    return out_t[:, :B].T                                                     # (B, out_dim)


def ref_forward(obs, thresholds, mapping, tuple_size, table):
    """Pure-JAX reference mirroring the PyTorch forward."""
    B = obs.shape[0]
    bits = (obs[:, :, None] > thresholds[None, None, :]).astype(jnp.float32).reshape(B, -1)
    xp = bits[:, mapping]                                                # x[:, self.mapping]
    key_w = 2.0 ** jnp.arange(tuple_size, dtype=jnp.float32)             # exp2(arange(T))
    keys = (xp.reshape(B, -1, tuple_size) * key_w).sum(-1).astype(jnp.int32)
    n_nodes = keys.shape[1]
    idx = keys + (2 ** tuple_size) * jnp.arange(n_nodes, dtype=jnp.int32)[None, :]
    flat_table = table.reshape(-1, table.shape[-1])
    return flat_table[idx].sum(axis=1)                                   # EmbeddingBag sum


if __name__ == "__main__":
    # Small shapes consistent with the module (input_dim divisible by tuple_size, as the torch
    # conv1d(stride=T) + mem_offsets broadcasting implicitly requires).
    B, obs_dim, res, tuple_size, num_outputs = 2, 4, 16, 8, 8
    vmin, vmax = -1.0, 1.0
    input_dim = obs_dim * res                 # 64
    n_nodes = input_dim // tuple_size         # 8

    thresholds = jnp.linspace(vmin, vmax, res + 2)[1:-1].astype(jnp.float32)

    key = jax.random.PRNGKey(0)
    k_map, k_obs, k_pol, k_vf = jax.random.split(key, 4)

    # stands in for torch.randperm(input_dim, generator=manual_seed(seed))
    mapping = jax.random.permutation(k_map, input_dim)

    # Fold permutation + conv1d(exp2 kernel, stride=T) into one (input_dim, n_nodes) matrix:
    #   keys[b, n] = sum_t bits[b, mapping[n*T + t]] * 2**t
    pos = jnp.arange(input_dim)
    w_keys = jnp.zeros((input_dim, n_nodes), jnp.float32).at[
        mapping, pos // tuple_size].set((2.0 ** (pos % tuple_size)).astype(jnp.float32))

    # EmbeddingBag weights (module zero-inits; deterministic small random values instead).
    policy_table = (0.01 * jax.random.normal(
        k_pol, (n_nodes, 2 ** tuple_size, num_outputs))).astype(jnp.float32)
    vf_table = (0.01 * jax.random.normal(
        k_vf, (n_nodes, 2 ** tuple_size, 1))).astype(jnp.float32)

    obs = jax.random.uniform(k_obs, (B, obs_dim), minval=vmin, maxval=vmax).astype(jnp.float32)

    # Fused heads: one pallas_call produces policy logits and value together, split on host.
    fused_table = jnp.concatenate([policy_table, vf_table], axis=-1)  # (n_nodes, 2**T, no+1)
    fused_out = ntn_apply(obs, thresholds, w_keys, fused_table, tuple_size)
    logits = fused_out[:, :num_outputs]          # forward(): policy logits
    value = fused_out[:, num_outputs]            # value_function(): atleast_1d(squeeze())
    jax.block_until_ready((logits, value))

    # Correctness check: the kernel streams the table as bf16 (per-element exact round), so the
    # reference uses the same bf16-rounded table values; gather/sum structure is identical.
    pol_bf = policy_table.astype(jnp.bfloat16).astype(jnp.float32)
    vf_bf = vf_table.astype(jnp.bfloat16).astype(jnp.float32)
    ref_logits = ref_forward(obs, thresholds, mapping, tuple_size, pol_bf)
    ref_value = ref_forward(obs, thresholds, mapping, tuple_size, vf_bf)[:, 0]
    np.testing.assert_allclose(np.asarray(logits), np.asarray(ref_logits), rtol=1e-5, atol=1e-6)
    np.testing.assert_allclose(np.asarray(value), np.asarray(ref_value), rtol=1e-5, atol=1e-6)

    assert logits.shape == (B, num_outputs) and value.shape == (B,)
    print("KERNEL_OK")
</pallas_src>

<mosaic_0001>
module attributes {stable_mosaic.version = 11 : i64} {
  func.func @ntn_kernel(%arg0: i32, %arg1: i32, %arg2: memref<4x2xf32, #tpu.memory_space<vmem>>, %arg3: memref<64x1xf32, #tpu.memory_space<vmem>>, %arg4: memref<8x64xbf16, #tpu.memory_space<vmem>>, %arg5: memref<9x2048xbf16, #tpu.memory_space<vmem>>, %arg6: memref<9x2xf32, #tpu.memory_space<vmem>>, %arg7: memref<64x2xbf16, #tpu.memory_space<vmem>>) attributes {dimension_semantics = [#tpu.dimension_semantics<parallel>, #tpu.dimension_semantics<arbitrary>], iteration_bounds = array<i64: 1, 1>, scalar_prefetch = 0 : i64, scratch_operands = 1 : i64, tpu.core_type = #tpu.core_type<tc>, window_params = [{transform_indices = @transform_0, window_bounds = array<i64: 4, 2>}, {pipeline_mode = #tpu.pipeline_mode<synchronous>, transform_indices = @transform_1, window_bounds = array<i64: 64, 1>}, {transform_indices = @transform_2, window_bounds = array<i64: 8, 64>}, {transform_indices = @transform_3, window_bounds = array<i64: 9, 2048>}, {transform_indices = @transform_4, window_bounds = array<i64: 9, 2>}]} {
    %c0_i32 = arith.constant 0 : i32
    %0 = arith.cmpi eq, %arg1, %c0_i32 : i32
    %1 = arith.extui %0 : i1 to i32
    %c0_i32_0 = arith.constant 0 : i32
    %2 = arith.cmpi ne, %1, %c0_i32_0 : i32
    scf.if %2 {
      %22 = tpu.iota {dimensions = array<i32: 0>} : vector<64x4xi32>
      %23 = tpu.iota {dimensions = array<i32: 1>} : vector<64x4xi32>
      %c16_i32 = arith.constant 16 : i32
      %24 = vector.broadcast %c16_i32 : i32 to vector<64x4xi32>
      %25 = arith.muli %23, %24 : vector<64x4xi32>
      %26 = arith.cmpi sge, %22, %25 : vector<64x4xi32>
      %c1_i32 = arith.constant 1 : i32
      %27 = vector.broadcast %c1_i32 : i32 to vector<64x4xi32>
      %28 = arith.addi %23, %27 : vector<64x4xi32>
      %c16_i32_11 = arith.constant 16 : i32
      %29 = vector.broadcast %c16_i32_11 : i32 to vector<64x4xi32>
      %30 = arith.muli %28, %29 : vector<64x4xi32>
      %31 = arith.cmpi slt, %22, %30 : vector<64x4xi32>
      %32 = arith.andi %26, %31 : vector<64x4xi1>
      %33 = arith.extui %32 : vector<64x4xi1> to vector<64x4xi32>
      %34 = arith.sitofp %33 : vector<64x4xi32> to vector<64x4xf32>
      %c0_12 = arith.constant 0 : index
      %c0_13 = arith.constant 0 : index
      %35 = vector.load %arg2[%c0_12, %c0_13] : memref<4x2xf32, #tpu.memory_space<vmem>>, vector<4x2xf32>
      %cst_14 = arith.constant dense<0.000000e+00> : vector<64x2xf32>
      %36 = tpu.matmul %34, %35, %cst_14 {dimension_numbers = #tpu.dot_dimension_numbers<[1], [0], [0], [1], [0, 0, 1, 1], [], []>} : vector<64x4xf32>, vector<4x2xf32>, vector<64x2xf32> -> vector<64x2xf32>
      %c0_15 = arith.constant 0 : index
      %c0_16 = arith.constant 0 : index
      %37 = vector.load %arg3[%c0_15, %c0_16] : memref<64x1xf32, #tpu.memory_space<vmem>>, vector<64x1xf32>
      %38 = vector.broadcast %37 : vector<64x1xf32> to vector<64x2xf32>
      %39 = arith.cmpf ogt, %36, %38 : vector<64x2xf32>
      %40 = arith.extui %39 : vector<64x2xi1> to vector<64x2xi32>
      %41 = arith.sitofp %40 : vector<64x2xi32> to vector<64x2xf32>
      %42 = arith.truncf %41 : vector<64x2xf32> to vector<64x2xbf16>
      %c0_17 = arith.constant 0 : index
      %c0_18 = arith.constant 0 : index
      %43 = vector.load %arg7[%c0_17, %c0_18] : memref<64x2xbf16, #tpu.memory_space<vmem>>, vector<64x2xbf16>
      tpu.vector_store %arg7[%c0_17, %c0_18], %42 {strides = array<i32>} : memref<64x2xbf16, #tpu.memory_space<vmem>>, vector<64x2xbf16>,
      %cst_19 = arith.constant 0.000000e+00 : f32
      %44 = vector.broadcast %cst_19 : f32 to vector<9x2xf32>
      %c0_20 = arith.constant 0 : index
      %c0_21 = arith.constant 0 : index
      %45 = vector.load %arg6[%c0_20, %c0_21] : memref<9x2xf32, #tpu.memory_space<vmem>>, vector<9x2xf32>
      tpu.vector_store %arg6[%c0_20, %c0_21], %44 {strides = array<i32>} : memref<9x2xf32, #tpu.memory_space<vmem>>, vector<9x2xf32>,
    } else {
    }
    %c0 = arith.constant 0 : index
    %c0_1 = arith.constant 0 : index
    %3 = vector.load %arg4[%c0, %c0_1] : memref<8x64xbf16, #tpu.memory_space<vmem>>, vector<8x64xbf16>
    %c0_2 = arith.constant 0 : index
    %c0_3 = arith.constant 0 : index
    %4 = vector.load %arg7[%c0_2, %c0_3] : memref<64x2xbf16, #tpu.memory_space<vmem>>, vector<64x2xbf16>
    %cst = arith.constant dense<0.000000e+00> : vector<8x2xf32>
    %5 = tpu.matmul %3, %4, %cst {dimension_numbers = #tpu.dot_dimension_numbers<[1], [0], [0], [1], [0, 0, 1, 1], [], []>} : vector<8x64xbf16>, vector<64x2xbf16>, vector<8x2xf32> -> vector<8x2xf32>
    %6 = arith.fptosi %5 : vector<8x2xf32> to vector<8x2xi32>
    %7 = tpu.iota {dimensions = array<i32: 0>} : vector<256x2xi32>
    %8 = vector.shape_cast %6 : vector<8x2xi32> to vector<8x1x2xi32>
    %9 = vector.shape_cast %7 : vector<256x2xi32> to vector<1x256x2xi32>
    %10 = vector.broadcast %8 : vector<8x1x2xi32> to vector<8x256x2xi32>
    %11 = vector.broadcast %9 : vector<1x256x2xi32> to vector<8x256x2xi32>
    %12 = arith.cmpi eq, %10, %11 : vector<8x256x2xi32>
    %13 = arith.extui %12 : vector<8x256x2xi1> to vector<8x256x2xi32>
    %14 = arith.sitofp %13 : vector<8x256x2xi32> to vector<8x256x2xf32>
    %15 = arith.truncf %14 : vector<8x256x2xf32> to vector<8x256x2xbf16>
    %16 = vector.shape_cast %15 : vector<8x256x2xbf16> to vector<2048x2xbf16>
    %c0_4 = arith.constant 0 : index
    %c0_5 = arith.constant 0 : index
    %17 = vector.load %arg6[%c0_4, %c0_5] : memref<9x2xf32, #tpu.memory_space<vmem>>, vector<9x2xf32>
    %c0_6 = arith.constant 0 : index
    %c0_7 = arith.constant 0 : index
    %18 = vector.load %arg5[%c0_6, %c0_7] : memref<9x2048xbf16, #tpu.memory_space<vmem>>, vector<9x2048xbf16>
    %cst_8 = arith.constant dense<0.000000e+00> : vector<9x2xf32>
    %19 = tpu.matmul %18, %16, %cst_8 {dimension_numbers = #tpu.dot_dimension_numbers<[1], [0], [0], [1], [0, 0, 1, 1], [], []>} : vector<9x2048xbf16>, vector<2048x2xbf16>, vector<9x2xf32> -> vector<9x2xf32>
    %20 = arith.addf %17, %19 : vector<9x2xf32>
    %c0_9 = arith.constant 0 : index
    %c0_10 = arith.constant 0 : index
    %21 = vector.load %arg6[%c0_9, %c0_10] : memref<9x2xf32, #tpu.memory_space<vmem>>, vector<9x2xf32>
    tpu.vector_store %arg6[%c0_9, %c0_10], %20 {strides = array<i32>} : memref<9x2xf32, #tpu.memory_space<vmem>>, vector<9x2xf32>,
    return
  }
  func.func @transform_0(%arg0: i32, %arg1: i32) -> (i32, i32) {
    %c0_i32 = arith.constant 0 : i32
    %c0_i32_0 = arith.constant 0 : i32
    return %c0_i32, %arg0 : i32, i32
  }
  func.func @transform_1(%arg0: i32, %arg1: i32) -> (i32, i32) {
    %c0_i32 = arith.constant 0 : i32
    %c0_i32_0 = arith.constant 0 : i32
    %c0_i32_1 = arith.constant 0 : i32
    return %c0_i32, %c0_i32_0 : i32, i32
  }
  func.func @transform_2(%arg0: i32, %arg1: i32) -> (i32, i32) {
    %c0_i32 = arith.constant 0 : i32
    %c0_i32_0 = arith.constant 0 : i32
    return %arg1, %c0_i32 : i32, i32
  }
  func.func @transform_3(%arg0: i32, %arg1: i32) -> (i32, i32) {
    %c0_i32 = arith.constant 0 : i32
    %c0_i32_0 = arith.constant 0 : i32
    return %c0_i32, %arg1 : i32, i32
  }
  func.func @transform_4(%arg0: i32, %arg1: i32) -> (i32, i32) {
    %c0_i32 = arith.constant 0 : i32
    %c0_i32_0 = arith.constant 0 : i32
    return %c0_i32, %arg0 : i32, i32
  }
}

</mosaic_0001>

<bundles_post_ra>
// kernel: tpu_custom_call.1
= control target key start
LH: loop header
LB: loop body
LE: loop exit
PB: predicated region body
PF: predicated region fallthrough
CT: control target
= control target key end

     0   :  { %9 = vsyncpa [#allocation4], 0  ;;  %s2901_s18 = smov [#allocation3]   ;;  %s2902_s20 = smov 1024   ;;  %s3947_s0 = inlined_call_operand.vmem [shape: f32[4,2], index: 0, kind: input, shape index: {}]   ;;  %s3948_s1 = inlined_call_operand.vmem [shape: f32[64,1], index: 1, kind: input, shape index: {}]   ;;  %s3949_s2 = inlined_call_operand.vmem [shape: bf16[8,64], index: 2, kind: input, shape index: {}]   ;;  %s3950_s3 = inlined_call_operand.hbm [shape: bf16[9,2048], index: 3, kind: input, shape index: {}]   ;;  %s3951_s4 = inlined_call_operand.vmem [shape: f32[9,2], index: 4, kind: output, shape index: {}]  }
   0x1   :  { %s20_s17 = sshll.u32 %s3950_s3, 4  ;;  %s22_s19 = sshll.u32 %s2901_s18, 4  ;;  %s21_s17 = int_to_ptr.hbm [resolvable:$true] %s20_s17  ;;  %s23_s19 = int_to_ptr.vmem [resolvable:$true] %s22_s19 }
   0x2   :  { %s2903_s21 = smov 64  }
   0x3   :  { %28 = dma.hbm_to_vmem [thread:$0]  %s21_s17, 2048, %s23_s19, [#allocation4], %s2902_s20, %s2902_s20, %s2903_s21  }
   0x4   :  { %2899 = dma.done.wait [#allocation4], 2048  }
   0x5   :  { %2900 = vsyncadd [#allocation4], 4294965248  ;;  %v38_v0 = vlaneseq  ;;  %v2904_v1 = vmov 0   ;;  %vm118_vm0 = vcmask 1043456   ;;  %v169_v8 = vld [vmem:[%s3948_s1 + $0x30] sm:$0xff]  ;;  %v167_v10 = vld [vmem:[%s3948_s1 + $0x20] sm:$0xff] }
   0x6   :  { %2872 = vset.pattern.permute.xlu0 %v2904_v1  ;;  %2873 = vset.pattern.permute.xlu1 %v2904_v1  ;;  %v92_v9 = vld [vmem:[%s3947_s0] sm:$0xf]  ;;  %vm93_vm3 = vcmask 31744   ;;  %v2905_v11 = vmov 0.0   ;;  %v170_v13 = vld [vmem:[%s3948_s1 + $0x38] sm:$0xff]  ;;  %v168_v14 = vld [vmem:[%s3948_s1 + $0x28] sm:$0xff] }
   0x7   :  { %v2934_v2 = vshrl.u32 %v38_v0, 7  ;;  %v48_v3 = vand.u32 127, %v38_v0  ;;  %2874 = vset.pattern.permute.xlu2 %v2904_v1  ;;  %203 = vperm.xlu0 %2872, %v169_v8   ;;  %v163_v17 = vld [vmem:[%s3948_s1] sm:$0xff]  ;;  %v164_v18 = vld [vmem:[%s3948_s1 + $0x8] sm:$0xff]  ;;  %v165_v21 = vld [vmem:[%s3948_s1 + $0x10] sm:$0xff] }
   0x8   :  { %2488 = vmatpush.msk.msra.mxu0 %vm118_vm0, %v92_v9  ;;  %193 = vperm.xlu1 %2873, %v167_v10   ;;  %v166_v24 = vld [vmem:[%s3948_s1 + $0x18] sm:$0xff] }
   0x9   :  { %v2936_v4 = vmul.u32 16, %v48_v3  ;;  %v58_v5 = vadd.s32 1, %v48_v3  ;;  %v2943_v7 = vadd.s32 8, %v2934_v2  ;;  %v2969_v15 = vadd.s32 16, %v2934_v2  ;;  %183 = vperm.xlu2 %2874, %v165_v21  }
   0xa   :  { %v2984_v19 = vadd.s32 24, %v2934_v2  ;;  %v2996_v22 = vadd.s32 32, %v2934_v2  ;;  %v3008_v25 = vadd.s32 40, %v2934_v2  ;;  %v3017_v27 = vadd.s32 48, %v2934_v2 }
   0xb   :  { %vm50_vm1 = vcmp.ge.s32.totalorder %v2934_v2, %v2936_v4  ;;  %v2940_v6 = vmul.u32 16, %v58_v5  ;;  %vm51_vm5 = vcmp.ge.s32.totalorder %v2943_v7, %v2936_v4  ;;  %vm52_vm8 = vcmp.ge.s32.totalorder %v2969_v15, %v2936_v4  ;;  %v256_v5 = vld [vmem:[%s3949_s2] sm:$0xf] }
   0xc   :  { %vm53_vm11 = vcmp.ge.s32.totalorder %v2984_v19, %v2936_v4  ;;  %vm54_vm14 = vcmp.ge.s32.totalorder %v2996_v22, %v2936_v4  ;;  %v3026_v29 = vadd.s32 56, %v2934_v2  ;;  %v3056_v10 = vadd.s32 112, %v2934_v2 }
   0xd   :  { %vm60_vm2 = vcmp.lt.s32.totalorder %v2934_v2, %v2940_v6  ;;  %vm61_vm6 = vcmp.lt.s32.totalorder %v2943_v7, %v2940_v6  ;;  %vm62_vm9 = vcmp.lt.s32.totalorder %v2969_v15, %v2940_v6  ;;  %vm63_vm12 = vcmp.lt.s32.totalorder %v2984_v19, %v2940_v6 }
   0xe   :  { %vm68_vm4 = vmand %vm50_vm1, %vm60_vm2  ;;  %vm64_vm15 = vcmp.lt.s32.totalorder %v2996_v22, %v2940_v6  ;;  %vm55_vm1 = vcmp.ge.s32.totalorder %v3008_v25, %v2936_v4  ;;  %vm65_vm2 = vcmp.lt.s32.totalorder %v3008_v25, %v2940_v6  ;;  %v3077_v21 = vadd.s32 232, %v2934_v2 }
   0xf   :  { %v2480_v12 = vsel %vm68_vm4, 1.0, %v2905_v11  ;;  %vm69_vm7 = vmand %vm51_vm5, %vm61_vm6  ;;  %208 = vperm.xlu0 %2872, %v170_v13   ;;  %vm56_vm5 = vcmp.ge.s32.totalorder %v3017_v27, %v2936_v4  ;;  %vm66_vm6 = vcmp.lt.s32.totalorder %v3017_v27, %v2940_v6  ;;  %v3062_v13 = vadd.s32 240, %v2934_v2 }
  0x10   :  { %2489 = vmatmul.msk.f32.vlgmr.msra.gmra.mxu0 %vm93_vm3, %v2480_v12  ;;  %v2481_v16 = vsel %vm69_vm7, 1.0, %v2905_v11  ;;  %198 = vperm.xlu1 %2873, %v168_v14   ;;  %vm70_vm10 = vmand %vm52_vm8, %vm62_vm9  ;;  %vm57_vm8 = vcmp.ge.s32.totalorder %v3026_v29, %v2936_v4  ;;  %vm67_vm9 = vcmp.lt.s32.totalorder %v3026_v29, %v2940_v6  ;;  %v3059_v12 = vadd.s32 120, %v2934_v2 }
  0x11   :  { %v2482_v20 = vsel %vm70_vm10, 1.0, %v2905_v11  ;;  %vm71_vm13 = vmand %vm53_vm11, %vm63_vm12  ;;  %188 = vperm.xlu2 %2874, %v166_v24   ;;  %vm243_vm12 = vcmask 11264   ;;  %v3065_v14 = vadd.s32 248, %v2934_v2  ;;  %v3082_v24 = vadd.s32 80, %v2934_v2 }
  0x12   :  { %v2483_v23 = vsel %vm71_vm13, 1.0, %v2905_v11  ;;  %vm72_vm0 = vmand %vm54_vm14, %vm64_vm15 }
  0x13   :  { %v2484_v26 = vsel %vm72_vm0, 1.0, %v2905_v11  ;;  %vm73_vm4 = vmand %vm55_vm1, %vm65_vm2 }
  0x14   :  { %v2485_v28 = vsel %vm73_vm4, 1.0, %v2905_v11  ;;  %vm74_vm7 = vmand %vm56_vm5, %vm66_vm6  ;;  %vm289_vm4 = vcmask 523264  }
  0x15   :  { %v2486_v30 = vsel %vm74_vm7, 1.0, %v2905_v11  ;;  %vm75_vm10 = vmand %vm57_vm8, %vm67_vm9 }
  0x16   :  { %v2487_v31 = vsel %vm75_vm10, 1.0, %v2905_v11 }
  0x17   :  { %173 = vperm.xlu0 %2872, %v163_v17  }
  0x18   :  { %2490 = vmatmul.msk.f32.gmra.mxu0 %vm93_vm3, %v2481_v16  ;;  %178 = vperm.xlu1 %2873, %v164_v18   ;;  %v3068_v16 = vadd.s32 96, %v2934_v2  ;;  %v3071_v18 = vadd.s32 104, %v2934_v2 }
  0x20   :  { %2491 = vmatmul.msk.f32.gmra.mxu0 %vm93_vm3, %v2482_v20  ;;  %v3074_v20 = vadd.s32 224, %v2934_v2 }
  0x28   :  { %2492 = vmatmul.msk.f32.gmra.mxu0 %vm93_vm3, %v2483_v23 }
  0x30   :  { %2493 = vmatmul.msk.f32.gmra.mxu0 %vm93_vm3, %v2484_v26  ;;  %v3085_v26 = vadd.s32 88, %v2934_v2 }
  0x38   :  { %2494 = vmatmul.msk.f32.gmra.mxu0 %vm93_vm3, %v2485_v28  ;;  %v3088_v28 = vadd.s32 208, %v2934_v2 }
  0x40   :  { %2495 = vmatmul.msk.f32.gmra.mxu0 %vm93_vm3, %v2486_v30  ;;  %v3091_v30 = vadd.s32 216, %v2934_v2 }
  0x48   :  { %2496 = vmatmul.msk.f32.gmra.mxu0 %vm93_vm3, %v2487_v31  ;;  %v3094_v31 = vadd.s32 64, %v2934_v2 }
  0x63   :  { %v184_v44 = vpop.permute.xlu2 %183 }
  0x6b   :  { %v189_v48 = vpop.permute.xlu2 %188 }
  0x79   :  { %v204_v32 = vpop.permute.xlu0 %203 }
  0x7a   :  { %v194_v33 = vpop.permute.xlu1 %193 }
  0x81   :  { %v209_v34 = vpop.permute.xlu0 %208 }
  0x82   :  { %v199_v35 = vpop.permute.xlu1 %198 }
  0x89   :  { %v174_v37 = vpop.permute.xlu0 %173 }
  0x8a   :  { %v179_v40 = vpop.permute.xlu1 %178 }
  0x8d   :  { %v139_v36 = vpop.f32.mrf.mxu0 }
  0x8e   :  { %vm211_vm11 = vcmp.gt.f32.partialorder %v139_v36, %v174_v37 }
  0x8f   :  { %v2497_v38 = vsel %vm211_vm11, 1.0, %v2905_v11 }
  0x90   :  { %v235_v39 = vpack.c.bf16 %v2497_v38, %v2497_v38 }
  0x92   :  { %244 = vst.msk [vmem:[#allocation2] sm:$0xf] %vm243_vm12, %v235_v39 }
  0x95   :  { %v142_v41 = vpop.f32.mrf.mxu0 }
  0x96   :  { %vm212_vm13 = vcmp.gt.f32.partialorder %v142_v41, %v179_v40  ;;  %v3112_v41 = vadd.s32 200, %v2934_v2 }
  0x97   :  { %v2498_v42 = vsel %vm212_vm13, 1.0, %v2905_v11 }
  0x98   :  { %v236_v43 = vpack.c.bf16 %v2498_v42, %v2498_v42 }
  0x9a   :  { %245 = vst.msk [vmem:[#allocation2 + $0x4] sm:$0xf] %vm243_vm12, %v236_v43 }
  0x9d   :  { %v145_v45 = vpop.f32.mrf.mxu0 }
  0x9e   :  { %vm213_vm3 = vcmp.gt.f32.partialorder %v145_v45, %v184_v44 }
  0x9f   :  { %v2499_v46 = vsel %vm213_vm3, 1.0, %v2905_v11 }
  0xa0   :  { %v237_v47 = vpack.c.bf16 %v2499_v46, %v2499_v46 }
  0xa1   :  { %v2842_v4 = vld [vmem:[#allocation2] sm:$0xff] }
  0xa2   :  { %246 = vst.msk [vmem:[#allocation2 + $0x8] sm:$0xf] %vm243_vm12, %v237_v47 }
  0xa5   :  { %v148_v49 = vpop.f32.mrf.mxu0 }
  0xa6   :  { %vm214_vm14 = vcmp.gt.f32.partialorder %v148_v49, %v189_v48 }
  0xa7   :  { %v2500_v50 = vsel %vm214_vm14, 1.0, %v2905_v11 }
  0xa8   :  { %v238_v51 = vpack.c.bf16 %v2500_v50, %v2500_v50 }
  0xaa   :  { %247 = vst.msk [vmem:[#allocation2 + $0xc] sm:$0xf] %vm243_vm12, %v238_v51 }
  0xad   :  { %v151_v52 = vpop.f32.mrf.mxu0 }
  0xae   :  { %vm215_vm15 = vcmp.gt.f32.partialorder %v151_v52, %v194_v33  ;;  %v3100_v33 = vadd.s32 192, %v2934_v2 }
  0xaf   :  { %v2501_v53 = vsel %vm215_vm15, 1.0, %v2905_v11 }
  0xb0   :  { %v239_v54 = vpack.c.bf16 %v2501_v53, %v2501_v53 }
  0xb1   :  { %v2843_v3 = vld [vmem:[#allocation2 + $0x8] sm:$0xff] }
  0xb2   :  { %248 = vst.msk [vmem:[#allocation2 + $0x10] sm:$0xf] %vm243_vm12, %v239_v54 }
  0xb5   :  { %v154_v55 = vpop.f32.mrf.mxu0 }
  0xb6   :  { %vm216_vm0 = vcmp.gt.f32.partialorder %v154_v55, %v199_v35 }
  0xb7   :  { %v2502_v56 = vsel %vm216_vm0, 1.0, %v2905_v11 }
  0xb8   :  { %v240_v57 = vpack.c.bf16 %v2502_v56, %v2502_v56 }
  0xba   :  { %249 = vst.msk [vmem:[#allocation2 + $0x14] sm:$0xf] %vm243_vm12, %v240_v57 }
  0xbd   :  { %v157_v58 = vpop.f32.mrf.mxu0 }
  0xbe   :  { %vm217_vm1 = vcmp.gt.f32.partialorder %v157_v58, %v204_v32  ;;  %v3097_v32 = vadd.s32 72, %v2934_v2 }
  0xbf   :  { %v2503_v59 = vsel %vm217_vm1, 1.0, %v2905_v11 }
  0xc0   :  { %v241_v60 = vpack.c.bf16 %v2503_v59, %v2503_v59 }
  0xc1   :  { %v2844_v1 = vld [vmem:[#allocation2 + $0x10] sm:$0xff] }
  0xc2   :  { %250 = vst.msk [vmem:[#allocation2 + $0x18] sm:$0xf] %vm243_vm12, %v241_v60 }
  0xc5   :  { %v160_v61 = vpop.f32.mrf.mxu0 }
  0xc6   :  { %vm218_vm2 = vcmp.gt.f32.partialorder %v160_v61, %v209_v34 }
  0xc7   :  { %v2504_v62 = vsel %vm218_vm2, 1.0, %v2905_v11 }
  0xc8   :  { %v242_v63 = vpack.c.bf16 %v2504_v62, %v2504_v62 }
  0xca   :  { %251 = vst.msk [vmem:[#allocation2 + $0x1c] sm:$0xf] %vm243_vm12, %v242_v63 }
  0xd1   :  { %v2845_v0 = vld [vmem:[#allocation2 + $0x18] sm:$0xff] }
  0xd2   :  { %297 = vmatpush.bf16.msra.mxu1 %v2845_v0 }
  0xd6   :  { %298 = vmatpush.bf16.msra.mxu1 %v2844_v1 }
  0xda   :  { %299 = vmatpush.bf16.msra.mxu1 %v2843_v3 }
  0xde   :  { %300 = vmatpush.bf16.msra.mxu1 %v2842_v4 }
  0xe1   :  { %2521 = vmatmul.msk.bf16.vlgmr.msra.gmra.mxu1 %vm289_vm4, %v256_v5 }
 0x15e   :  { %v302_v6 = vpop.f32.mrf.mxu1 }
 0x15f   :  { %vm2862_vm5 = vcmp.lt.s32.totalorder %v302_v6, 0  ;;  %v2863_v8 = vceil.f32 %v302_v6  ;;  %v2864_v9 = vfloor.f32 %v302_v6 }
 0x161   :  { %v2865_v17 = vsel %vm2862_vm5, %v2863_v8, %v2864_v9 }
 0x162   :  { %v3079_v23 = vcvt.f32.s32 %v2865_v17 }
 0x164   :  { %v340_v34 = vrot.slane %v3079_v23, 1  ;;  %v341_v35 = vrot.slane %v3079_v23, 2  ;;  %v342_v36 = vrot.slane %v3079_v23, 3  ;;  %v343_v37 = vrot.slane %v3079_v23, 4 }
 0x165   :  { %v344_v38 = vrot.slane %v3079_v23, 5  ;;  %v345_v39 = vrot.slane %v3079_v23, 6  ;;  %v3109_v40 = vperm.slane %v3079_v23, 0  ;;  %v346_v42 = vrot.slane %v3079_v23, 7 }
 0x166   :  { %v3115_v43 = vperm.slane %v340_v34, 0  ;;  %v3117_v44 = vperm.slane %v341_v35, 0  ;;  %v3119_v45 = vperm.slane %v342_v36, 0  ;;  %v304_v46 = vpop.f32.mrf.mxu1  ;;  %v3121_v47 = vperm.slane %v343_v37, 0 }
 0x167   :  { %v3123_v48 = vperm.slane %v344_v38, 0  ;;  %v3125_v49 = vperm.slane %v345_v39, 0  ;;  %vm369_vm6 = vcmp.eq.s32.totalorder %v3109_v40, %v3056_v10  ;;  %vm370_vm7 = vcmp.eq.s32.totalorder %v3109_v40, %v3059_v12 }
 0x168   :  { %v2536_v50 = vsel %vm369_vm6, 1.0, %v2905_v11  ;;  %vm385_vm8 = vcmp.eq.s32.totalorder %v3109_v40, %v3062_v13  ;;  %vm386_vm9 = vcmp.eq.s32.totalorder %v3109_v40, %v3065_v14  ;;  %v2537_v51 = vsel %vm370_vm7, 1.0, %v2905_v11 }
 0x169   :  { %v1137_v52 = vpack.c.bf16 %v2536_v50, %v2536_v50  ;;  %v2552_v53 = vsel %vm385_vm8, 1.0, %v2905_v11  ;;  %v2553_v54 = vsel %vm386_vm9, 1.0, %v2905_v11  ;;  %v1138_v55 = vpack.c.bf16 %v2537_v51, %v2537_v51 }
 0x16a   :  { %v1153_v56 = vpack.c.bf16 %v2552_v53, %v2552_v53  ;;  %v1154_v57 = vpack.c.bf16 %v2553_v54, %v2553_v54  ;;  %vm401_vm10 = vcmp.eq.s32.totalorder %v3115_v43, %v3056_v10  ;;  %vm402_vm11 = vcmp.eq.s32.totalorder %v3115_v43, %v3059_v12 }
 0x16b   :  { %v1747_v58 = vunpack.c.l.b16 %v1137_v52  ;;  %v2568_v59 = vsel %vm401_vm10, 1.0, %v2905_v11  ;;  %vm449_vm12 = vcmp.eq.s32.totalorder %v3117_v44, %v3062_v13  ;;  %v1748_v60 = vunpack.c.l.b16 %v1138_v55 }
 0x16c   :  { %v1763_v61 = vunpack.c.l.b16 %v1153_v56  ;;  %v1764_v62 = vunpack.c.l.b16 %v1154_v57  ;;  %v2569_v63 = vsel %vm402_vm11, 1.0, %v2905_v11  ;;  %v1169_v0 = vpack.c.bf16 %v2568_v59, %v2568_v59 }
 0x16d   :  { %v1170_v1 = vpack.c.bf16 %v2569_v63, %v2569_v63  ;;  %vm450_vm13 = vcmp.eq.s32.totalorder %v3117_v44, %v3065_v14  ;;  %v2616_v3 = vsel %vm449_vm12, 1.0, %v2905_v11  ;;  %v1996_v4 = vpack.c.b16 %v1748_v60, %v1747_v58 }
 0x16e   :  { %v2004_v5 = vpack.c.b16 %v1764_v62, %v1763_v61  ;;  %v2617_v6 = vsel %vm450_vm13, 1.0, %v2905_v11  ;;  %v1217_v8 = vpack.c.bf16 %v2616_v3, %v2616_v3  ;;  %v1779_v9 = vunpack.c.l.b16 %v1169_v0 }
 0x16f   :  { %v1780_v17 = vunpack.c.l.b16 %v1170_v1  ;;  %v1218_v34 = vpack.c.bf16 %v2617_v6, %v2617_v6  ;;  %vm367_vm3 = vcmp.eq.s32.totalorder %v3109_v40, %v3068_v16  ;;  %2245 = vmatpush.bf16.msra.mxu2 %v1996_v4  ;;  %vm368_vm14 = vcmp.eq.s32.totalorder %v3109_v40, %v3071_v18 }
 0x170   :  { %2259 = vmatpush.bf16.msra.mxu3 %v2004_v5  ;;  %v1827_v35 = vunpack.c.l.b16 %v1217_v8  ;;  %v2534_v36 = vsel %vm367_vm3, 1.0, %v2905_v11  ;;  %vm383_vm15 = vcmp.eq.s32.totalorder %v3109_v40, %v3074_v20  ;;  %v2535_v39 = vsel %vm368_vm14, 1.0, %v2905_v11 }
 0x171   :  { %v2012_v37 = vpack.c.b16 %v1780_v17, %v1779_v9  ;;  %v1828_v38 = vunpack.c.l.b16 %v1218_v34  ;;  %v1135_v46 = vpack.c.bf16 %v2534_v36, %v2534_v36  ;;  %v1136_v50 = vpack.c.bf16 %v2535_v39, %v2535_v39 }
 0x172   :  { %vm384_vm0 = vcmp.eq.s32.totalorder %v3109_v40, %v3077_v21  ;;  %v2550_v51 = vsel %vm383_vm15, 1.0, %v2905_v11  ;;  %vm399_vm1 = vcmp.eq.s32.totalorder %v3115_v43, %v3068_v16  ;;  %vm400_vm2 = vcmp.eq.s32.totalorder %v3115_v43, %v3071_v18 }
 0x173   :  { %2273 = vmatpush.bf16.msrb.mxu1 %v2012_v37  ;;  %v2036_v52 = vpack.c.b16 %v1828_v38, %v1827_v35  ;;  %v1745_v53 = vunpack.c.l.b16 %v1135_v46  ;;  %v2551_v54 = vsel %vm384_vm0, 1.0, %v2905_v11  ;;  %v1151_v55 = vpack.c.bf16 %v2550_v51, %v2550_v51 }
 0x174   :  { %v1746_v56 = vunpack.c.l.b16 %v1136_v50  ;;  %v1152_v57 = vpack.c.bf16 %v2551_v54, %v2551_v54  ;;  %v2566_v58 = vsel %vm399_vm1, 1.0, %v2905_v11  ;;  %v2567_v60 = vsel %vm400_vm2, 1.0, %v2905_v11 }
 0x175   :  { %2315 = vmatpush.bf16.msrb.mxu0 %v2036_v52  ;;  %v1761_v59 = vunpack.c.l.b16 %v1151_v55  ;;  %v1167_v61 = vpack.c.bf16 %v2566_v58, %v2566_v58  ;;  %vm447_vm4 = vcmp.eq.s32.totalorder %v3117_v44, %v3074_v20  ;;  %v1168_v0 = vpack.c.bf16 %v2567_v60, %v2567_v60 }
 0x176   :  { %v1995_v62 = vpack.c.b16 %v1746_v56, %v1745_v53  ;;  %v1762_v63 = vunpack.c.l.b16 %v1152_v57  ;;  %vm448_vm5 = vcmp.eq.s32.totalorder %v3117_v44, %v3077_v21  ;;  %v2614_v3 = vsel %vm447_vm4, 1.0, %v2905_v11 }
 0x177   :  { %v1777_v1 = vunpack.c.l.b16 %v1167_v61  ;;  %v2615_v4 = vsel %vm448_vm5, 1.0, %v2905_v11  ;;  %vm365_vm6 = vcmp.eq.s32.totalorder %v3109_v40, %v3082_v24  ;;  %v1778_v6 = vunpack.c.l.b16 %v1168_v0 }
 0x178   :  { %2246 = vmatpush.bf16.msra.mxu2 %v1995_v62  ;;  %v2003_v5 = vpack.c.b16 %v1762_v63, %v1761_v59  ;;  %v1215_v8 = vpack.c.bf16 %v2614_v3, %v2614_v3  ;;  %v1216_v9 = vpack.c.bf16 %v2615_v4, %v2615_v4  ;;  %vm366_vm7 = vcmp.eq.s32.totalorder %v3109_v40, %v3085_v26 }
 0x179   :  { %v2532_v17 = vsel %vm365_vm6, 1.0, %v2905_v11  ;;  %vm381_vm8 = vcmp.eq.s32.totalorder %v3109_v40, %v3088_v28  ;;  %vm382_vm9 = vcmp.eq.s32.totalorder %v3109_v40, %v3091_v30  ;;  %v2011_v34 = vpack.c.b16 %v1778_v6, %v1777_v1 }
 0x17a   :  { %2260 = vmatpush.bf16.msra.mxu3 %v2003_v5  ;;  %v1825_v35 = vunpack.c.l.b16 %v1215_v8  ;;  %v1826_v36 = vunpack.c.l.b16 %v1216_v9  ;;  %v2533_v37 = vsel %vm366_vm7, 1.0, %v2905_v11  ;;  %v1133_v38 = vpack.c.bf16 %v2532_v17, %v2532_v17 }
 0x17b   :  { %v1134_v39 = vpack.c.bf16 %v2533_v37, %v2533_v37  ;;  %v2548_v46 = vsel %vm381_vm8, 1.0, %v2905_v11  ;;  %v2549_v50 = vsel %vm382_vm9, 1.0, %v2905_v11  ;;  %2274 = vmatpush.bf16.msrb.mxu1 %v2011_v34  ;;  %vm397_vm10 = vcmp.eq.s32.totalorder %v3115_v43, %v3082_v24 }
 0x17c   :  { %v2035_v51 = vpack.c.b16 %v1826_v36, %v1825_v35  ;;  %v1149_v52 = vpack.c.bf16 %v2548_v46, %v2548_v46  ;;  %v1150_v53 = vpack.c.bf16 %v2549_v50, %v2549_v50  ;;  %v1743_v54 = vunpack.c.l.b16 %v1133_v38 }
 0x17d   :  { %v1744_v55 = vunpack.c.l.b16 %v1134_v39  ;;  %vm398_vm11 = vcmp.eq.s32.totalorder %v3115_v43, %v3085_v26  ;;  %v2564_v56 = vsel %vm397_vm10, 1.0, %v2905_v11  ;;  %vm445_vm12 = vcmp.eq.s32.totalorder %v3117_v44, %v3088_v28 }
 0x17e   :  { %2316 = vmatpush.bf16.msrb.mxu0 %v2035_v51  ;;  %v1759_v57 = vunpack.c.l.b16 %v1149_v52  ;;  %v1760_v58 = vunpack.c.l.b16 %v1150_v53  ;;  %v2565_v59 = vsel %vm398_vm11, 1.0, %v2905_v11  ;;  %v1165_v60 = vpack.c.bf16 %v2564_v56, %v2564_v56 }
 0x17f   :  { %v1994_v61 = vpack.c.b16 %v1744_v55, %v1743_v54  ;;  %v1166_v62 = vpack.c.bf16 %v2565_v59, %v2565_v59  ;;  %vm446_vm13 = vcmp.eq.s32.totalorder %v3117_v44, %v3091_v30  ;;  %v2612_v1 = vsel %vm445_vm12, 1.0, %v2905_v11 }
 0x180   :  { %v2002_v63 = vpack.c.b16 %v1760_v58, %v1759_v57  ;;  %v1775_v0 = vunpack.c.l.b16 %v1165_v60  ;;  %v2613_v3 = vsel %vm446_vm13, 1.0, %v2905_v11  ;;  %v1213_v5 = vpack.c.bf16 %v2612_v1, %v2612_v1 }
 0x181   :  { %2247 = vmatpush.bf16.msra.mxu2 %v1994_v61  ;;  %v1776_v4 = vunpack.c.l.b16 %v1166_v62  ;;  %v1214_v6 = vpack.c.bf16 %v2613_v3, %v2613_v3  ;;  %vm363_vm3 = vcmp.eq.s32.totalorder %v3109_v40, %v3094_v31  ;;  %vm364_vm14 = vcmp.eq.s32.totalorder %v3109_v40, %v3097_v32 }
 0x182   :  { %2261 = vmatpush.bf16.msra.mxu3 %v2002_v63  ;;  %v2530_v8 = vsel %vm363_vm3, 1.0, %v2905_v11  ;;  %vm379_vm15 = vcmp.eq.s32.totalorder %v3109_v40, %v3100_v33  ;;  %vm380_vm0 = vcmp.eq.s32.totalorder %v3109_v40, %v3112_v41  ;;  %v1823_v17 = vunpack.c.l.b16 %v1213_v5 }
 0x183   :  { %v2010_v9 = vpack.c.b16 %v1776_v4, %v1775_v0  ;;  %v1824_v34 = vunpack.c.l.b16 %v1214_v6  ;;  %v2531_v35 = vsel %vm364_vm14, 1.0, %v2905_v11  ;;  %v1131_v36 = vpack.c.bf16 %v2530_v8, %v2530_v8 }
 0x184   :  { %v1132_v37 = vpack.c.bf16 %v2531_v35, %v2531_v35  ;;  %v2546_v38 = vsel %vm379_vm15, 1.0, %v2905_v11  ;;  %v2547_v39 = vsel %vm380_vm0, 1.0, %v2905_v11  ;;  %vm395_vm1 = vcmp.eq.s32.totalorder %v3115_v43, %v3094_v31 }
 0x185   :  { %2275 = vmatpush.bf16.msrb.mxu1 %v2010_v9  ;;  %v2034_v46 = vpack.c.b16 %v1824_v34, %v1823_v17  ;;  %v1147_v50 = vpack.c.bf16 %v2546_v38, %v2546_v38  ;;  %v1148_v51 = vpack.c.bf16 %v2547_v39, %v2547_v39  ;;  %v1741_v52 = vunpack.c.l.b16 %v1131_v36 }
 0x186   :  { %v1742_v53 = vunpack.c.l.b16 %v1132_v37  ;;  %vm396_vm2 = vcmp.eq.s32.totalorder %v3115_v43, %v3097_v32  ;;  %v2562_v54 = vsel %vm395_vm1, 1.0, %v2905_v11  ;;  %vm443_vm4 = vcmp.eq.s32.totalorder %v3117_v44, %v3100_v33 }
 0x187   :  { %2317 = vmatpush.bf16.msrb.mxu0 %v2034_v46  ;;  %v1757_v55 = vunpack.c.l.b16 %v1147_v50  ;;  %v1758_v56 = vunpack.c.l.b16 %v1148_v51  ;;  %v2563_v57 = vsel %vm396_vm2, 1.0, %v2905_v11  ;;  %v1163_v58 = vpack.c.bf16 %v2562_v54, %v2562_v54 }
 0x188   :  { %v1993_v59 = vpack.c.b16 %v1742_v53, %v1741_v52  ;;  %v1164_v60 = vpack.c.bf16 %v2563_v57, %v2563_v57  ;;  %vm444_vm5 = vcmp.eq.s32.totalorder %v3117_v44, %v3112_v41  ;;  %v2610_v63 = vsel %vm443_vm4, 1.0, %v2905_v11 }
 0x189   :  { %v2001_v61 = vpack.c.b16 %v1758_v56, %v1757_v55  ;;  %v1773_v62 = vunpack.c.l.b16 %v1163_v58  ;;  %v2611_v0 = vsel %vm444_vm5, 1.0, %v2905_v11  ;;  %v1211_v3 = vpack.c.bf16 %v2610_v63, %v2610_v63 }
 0x18a   :  { %2248 = vmatpush.bf16.msra.mxu2 %v1993_v59  ;;  %v1774_v1 = vunpack.c.l.b16 %v1164_v60  ;;  %v1212_v4 = vpack.c.bf16 %v2611_v0, %v2611_v0  ;;  %vm361_vm6 = vcmp.eq.s32.totalorder %v3109_v40, %v3017_v27  ;;  %vm362_vm7 = vcmp.eq.s32.totalorder %v3109_v40, %v3026_v29 }
 0x18b   :  { %2262 = vmatpush.bf16.msra.mxu3 %v2001_v61  ;;  %v2528_v5 = vsel %vm361_vm6, 1.0, %v2905_v11  ;;  %v3229_v6 = vadd.s32 176, %v2934_v2  ;;  %v3232_v8 = vadd.s32 184, %v2934_v2  ;;  %v1821_v17 = vunpack.c.l.b16 %v1211_v3 }
 0x18c   :  { %v2009_v9 = vpack.c.b16 %v1774_v1, %v1773_v62  ;;  %v1822_v34 = vunpack.c.l.b16 %v1212_v4  ;;  %v2529_v35 = vsel %vm362_vm7, 1.0, %v2905_v11  ;;  %v1129_v36 = vpack.c.bf16 %v2528_v5, %v2528_v5 }
 0x18d   :  { %v1130_v37 = vpack.c.bf16 %v2529_v35, %v2529_v35  ;;  %vm377_vm8 = vcmp.eq.s32.totalorder %v3109_v40, %v3229_v6  ;;  %vm378_vm9 = vcmp.eq.s32.totalorder %v3109_v40, %v3232_v8  ;;  %vm393_vm10 = vcmp.eq.s32.totalorder %v3115_v43, %v3017_v27 }
 0x18e   :  { %2276 = vmatpush.bf16.msrb.mxu1 %v2009_v9  ;;  %v2033_v38 = vpack.c.b16 %v1822_v34, %v1821_v17  ;;  %v2544_v39 = vsel %vm377_vm8, 1.0, %v2905_v11  ;;  %v2545_v46 = vsel %vm378_vm9, 1.0, %v2905_v11  ;;  %v1739_v50 = vunpack.c.l.b16 %v1129_v36 }
 0x18f   :  { %v1740_v51 = vunpack.c.l.b16 %v1130_v37  ;;  %v1145_v52 = vpack.c.bf16 %v2544_v39, %v2544_v39  ;;  %v1146_v53 = vpack.c.bf16 %v2545_v46, %v2545_v46  ;;  %vm394_vm11 = vcmp.eq.s32.totalorder %v3115_v43, %v3026_v29 }
 0x190   :  { %2318 = vmatpush.bf16.msrb.mxu0 %v2033_v38  ;;  %v2560_v54 = vsel %vm393_vm10, 1.0, %v2905_v11  ;;  %vm441_vm12 = vcmp.eq.s32.totalorder %v3117_v44, %v3229_v6  ;;  %vm442_vm13 = vcmp.eq.s32.totalorder %v3117_v44, %v3232_v8  ;;  %v2561_v58 = vsel %vm394_vm11, 1.0, %v2905_v11 }
 0x191   :  { %v1992_v55 = vpack.c.b16 %v1740_v51, %v1739_v50  ;;  %v1755_v56 = vunpack.c.l.b16 %v1145_v52  ;;  %v1756_v57 = vunpack.c.l.b16 %v1146_v53  ;;  %v1161_v59 = vpack.c.bf16 %v2560_v54, %v2560_v54 }
 0x192   :  { %v1162_v60 = vpack.c.bf16 %v2561_v58, %v2561_v58  ;;  %v2608_v61 = vsel %vm441_vm12, 1.0, %v2905_v11  ;;  %v2609_v62 = vsel %vm442_vm13, 1.0, %v2905_v11  ;;  %vm359_vm3 = vcmp.eq.s32.totalorder %v3109_v40, %v2996_v22 }
 0x193   :  { %2249 = vmatpush.bf16.msra.mxu2 %v1992_v55  ;;  %v2000_v63 = vpack.c.b16 %v1756_v57, %v1755_v56  ;;  %v1209_v0 = vpack.c.bf16 %v2608_v61, %v2608_v61  ;;  %v1210_v1 = vpack.c.bf16 %v2609_v62, %v2609_v62  ;;  %v1771_v3 = vunpack.c.l.b16 %v1161_v59 }
 0x194   :  { %v1772_v4 = vunpack.c.l.b16 %v1162_v60  ;;  %vm360_vm14 = vcmp.eq.s32.totalorder %v3109_v40, %v3008_v25  ;;  %v2526_v5 = vsel %vm359_vm3, 1.0, %v2905_v11  ;;  %v3260_v38 = vadd.s32 160, %v2934_v2 }
 0x195   :  { %2263 = vmatpush.bf16.msra.mxu3 %v2000_v63  ;;  %v1819_v9 = vunpack.c.l.b16 %v1209_v0  ;;  %v1820_v17 = vunpack.c.l.b16 %v1210_v1  ;;  %v2527_v34 = vsel %vm360_vm14, 1.0, %v2905_v11  ;;  %v1127_v35 = vpack.c.bf16 %v2526_v5, %v2526_v5 }
 0x196   :  { %v2008_v36 = vpack.c.b16 %v1772_v4, %v1771_v3  ;;  %v1128_v37 = vpack.c.bf16 %v2527_v34, %v2527_v34  ;;  %v3263_v39 = vadd.s32 168, %v2934_v2  ;;  %vm391_vm15 = vcmp.eq.s32.totalorder %v3115_v43, %v2996_v22 }
 0x197   :  { %v2032_v46 = vpack.c.b16 %v1820_v17, %v1819_v9  ;;  %v1737_v50 = vunpack.c.l.b16 %v1127_v35  ;;  %vm392_vm0 = vcmp.eq.s32.totalorder %v3115_v43, %v3008_v25  ;;  %vm375_vm1 = vcmp.eq.s32.totalorder %v3109_v40, %v3260_v38 }
 0x198   :  { %2277 = vmatpush.bf16.msrb.mxu1 %v2008_v36  ;;  %v1738_v51 = vunpack.c.l.b16 %v1128_v37  ;;  %vm376_vm2 = vcmp.eq.s32.totalorder %v3109_v40, %v3263_v39  ;;  %v2558_v52 = vsel %vm391_vm15, 1.0, %v2905_v11  ;;  %v2542_v53 = vsel %vm375_vm1, 1.0, %v2905_v11 }
 0x199   :  { %2319 = vmatpush.bf16.msrb.mxu0 %v2032_v46  ;;  %v2543_v54 = vsel %vm376_vm2, 1.0, %v2905_v11  ;;  %v2559_v55 = vsel %vm392_vm0, 1.0, %v2905_v11  ;;  %v1159_v56 = vpack.c.bf16 %v2558_v52, %v2558_v52  ;;  %v1143_v58 = vpack.c.bf16 %v2542_v53, %v2542_v53 }
 0x19a   :  { %v1991_v57 = vpack.c.b16 %v1738_v51, %v1737_v50  ;;  %v1144_v59 = vpack.c.bf16 %v2543_v54, %v2543_v54  ;;  %v1160_v60 = vpack.c.bf16 %v2559_v55, %v2559_v55  ;;  %vm439_vm4 = vcmp.eq.s32.totalorder %v3117_v44, %v3260_v38 }
 0x19b   :  { %v1769_v61 = vunpack.c.l.b16 %v1159_v56  ;;  %vm440_vm5 = vcmp.eq.s32.totalorder %v3117_v44, %v3263_v39  ;;  %vm357_vm6 = vcmp.eq.s32.totalorder %v3109_v40, %v2969_v15  ;;  %v1753_v62 = vunpack.c.l.b16 %v1143_v58 }
 0x19c   :  { %2250 = vmatpush.bf16.msra.mxu2 %v1991_v57  ;;  %v1754_v63 = vunpack.c.l.b16 %v1144_v59  ;;  %v1770_v0 = vunpack.c.l.b16 %v1160_v60  ;;  %v2606_v1 = vsel %vm439_vm4, 1.0, %v2905_v11  ;;  %v2607_v3 = vsel %vm440_vm5, 1.0, %v2905_v11 }
 0x19d   :  { %v1207_v4 = vpack.c.bf16 %v2606_v1, %v2606_v1  ;;  %vm358_vm7 = vcmp.eq.s32.totalorder %v3109_v40, %v2984_v19  ;;  %v2524_v5 = vsel %vm357_vm6, 1.0, %v2905_v11  ;;  %v1208_v34 = vpack.c.bf16 %v2607_v3, %v2607_v3 }
 0x19e   :  { %v1999_v9 = vpack.c.b16 %v1754_v63, %v1753_v62  ;;  %v2007_v17 = vpack.c.b16 %v1770_v0, %v1769_v61  ;;  %v2525_v35 = vsel %vm358_vm7, 1.0, %v2905_v11  ;;  %v1125_v37 = vpack.c.bf16 %v2524_v5, %v2524_v5 }
 0x19f   :  { %v1817_v36 = vunpack.c.l.b16 %v1207_v4  ;;  %v1126_v46 = vpack.c.bf16 %v2525_v35, %v2525_v35  ;;  %v3290_v50 = vadd.s32 144, %v2934_v2  ;;  %v1818_v51 = vunpack.c.l.b16 %v1208_v34 }
 0x1a0   :  { %2264 = vmatpush.bf16.msra.mxu3 %v1999_v9  ;;  %2278 = vmatpush.bf16.msrb.mxu1 %v2007_v17  ;;  %v3293_v52 = vadd.s32 152, %v2934_v2  ;;  %vm389_vm8 = vcmp.eq.s32.totalorder %v3115_v43, %v2969_v15  ;;  %vm390_vm9 = vcmp.eq.s32.totalorder %v3115_v43, %v2984_v19  ;;  %v1735_v53 = vunpack.c.l.b16 %v1125_v37 }
 0x1a1   :  { %v1736_v54 = vunpack.c.l.b16 %v1126_v46  ;;  %vm373_vm10 = vcmp.eq.s32.totalorder %v3109_v40, %v3290_v50  ;;  %v2556_v55 = vsel %vm389_vm8, 1.0, %v2905_v11  ;;  %v2031_v56 = vpack.c.b16 %v1818_v51, %v1817_v36 }
 0x1a2   :  { %vm374_vm11 = vcmp.eq.s32.totalorder %v3109_v40, %v3293_v52  ;;  %v2540_v57 = vsel %vm373_vm10, 1.0, %v2905_v11  ;;  %v2557_v58 = vsel %vm390_vm9, 1.0, %v2905_v11  ;;  %v1157_v62 = vpack.c.bf16 %v2556_v55, %v2556_v55 }
 0x1a3   :  { %v1990_v59 = vpack.c.b16 %v1736_v54, %v1735_v53  ;;  %v2541_v60 = vsel %vm374_vm11, 1.0, %v2905_v11  ;;  %v1141_v61 = vpack.c.bf16 %v2540_v57, %v2540_v57  ;;  %2320 = vmatpush.bf16.msrb.mxu0 %v2031_v56  ;;  %v1158_v0 = vpack.c.bf16 %v2557_v58, %v2557_v58 }
 0x1a4   :  { %v1142_v63 = vpack.c.bf16 %v2541_v60, %v2541_v60  ;;  %vm437_vm12 = vcmp.eq.s32.totalorder %v3117_v44, %v3290_v50  ;;  %vm438_vm13 = vcmp.eq.s32.totalorder %v3117_v44, %v3293_v52  ;;  %v1767_v3 = vunpack.c.l.b16 %v1157_v62 }
 0x1a5   :  { %2251 = vmatpush.bf16.msra.mxu2 %v1990_v59  ;;  %v1751_v1 = vunpack.c.l.b16 %v1141_v61  ;;  %v2604_v4 = vsel %vm437_vm12, 1.0, %v2905_v11  ;;  %v2605_v5 = vsel %vm438_vm13, 1.0, %v2905_v11  ;;  %v1768_v17 = vunpack.c.l.b16 %v1158_v0 }
 0x1a6   :  { %v1752_v9 = vunpack.c.l.b16 %v1142_v63  ;;  %v1205_v34 = vpack.c.bf16 %v2604_v4, %v2604_v4  ;;  %v1206_v35 = vpack.c.bf16 %v2605_v5, %v2605_v5  ;;  %vm355_vm3 = vcmp.eq.s32.totalorder %v3109_v40, %v2934_v2 }
 0x1a7   :  { %vm356_vm14 = vcmp.eq.s32.totalorder %v3109_v40, %v2943_v7  ;;  %v3318_v36 = vadd.s32 128, %v2934_v2  ;;  %v3321_v37 = vadd.s32 136, %v2934_v2  ;;  %v2006_v51 = vpack.c.b16 %v1768_v17, %v1767_v3 }
 0x1a8   :  { %v1998_v46 = vpack.c.b16 %v1752_v9, %v1751_v1  ;;  %v1815_v53 = vunpack.c.l.b16 %v1205_v34  ;;  %v1816_v54 = vunpack.c.l.b16 %v1206_v35  ;;  %v2522_v55 = vsel %vm355_vm3, 1.0, %v2905_v11 }
 0x1a9   :  { %v2523_v56 = vsel %vm356_vm14, 1.0, %v2905_v11  ;;  %vm371_vm15 = vcmp.eq.s32.totalorder %v3109_v40, %v3318_v36  ;;  %vm372_vm0 = vcmp.eq.s32.totalorder %v3109_v40, %v3321_v37  ;;  %2279 = vmatpush.bf16.msrb.mxu1 %v2006_v51  ;;  %v1123_v58 = vpack.c.bf16 %v2522_v55, %v2522_v55 }
 0x1aa   :  { %2265 = vmatpush.bf16.msra.mxu3 %v1998_v46  ;;  %v2030_v57 = vpack.c.b16 %v1816_v54, %v1815_v53  ;;  %v1124_v59 = vpack.c.bf16 %v2523_v56, %v2523_v56  ;;  %v2538_v60 = vsel %vm371_vm15, 1.0, %v2905_v11  ;;  %v2539_v61 = vsel %vm372_vm0, 1.0, %v2905_v11 }
 0x1ab   :  { %v1139_v62 = vpack.c.bf16 %v2538_v60, %v2538_v60  ;;  %vm417_vm1 = vcmp.eq.s32.totalorder %v3115_v43, %v3062_v13  ;;  %vm418_vm2 = vcmp.eq.s32.totalorder %v3115_v43, %v3065_v14  ;;  %v1733_v63 = vunpack.c.l.b16 %v1123_v58 }
 0x1ac   :  { %2321 = vmatpush.bf16.msrb.mxu0 %v2030_v57  ;;  %v1734_v0 = vunpack.c.l.b16 %v1124_v59  ;;  %v1140_v40 = vpack.c.bf16 %v2539_v61, %v2539_v61  ;;  %v2584_v1 = vsel %vm417_vm1, 1.0, %v2905_v11  ;;  %v2585_v4 = vsel %vm418_vm2, 1.0, %v2905_v11 }
 0x1ad   :  { %v1749_v3 = vunpack.c.l.b16 %v1139_v62  ;;  %v1185_v5 = vpack.c.bf16 %v2584_v1, %v2584_v1  ;;  %vm433_vm4 = vcmp.eq.s32.totalorder %v3117_v44, %v3056_v10  ;;  %v1186_v34 = vpack.c.bf16 %v2585_v4, %v2585_v4 }
 0x1ae   :  { %v1989_v9 = vpack.c.b16 %v1734_v0, %v1733_v63  ;;  %v1750_v17 = vunpack.c.l.b16 %v1140_v40  ;;  %vm434_vm5 = vcmp.eq.s32.totalorder %v3117_v44, %v3059_v12  ;;  %v2600_v46 = vsel %vm433_vm4, 1.0, %v2905_v11 }
 0x1af   :  { %v1795_v35 = vunpack.c.l.b16 %v1185_v5  ;;  %v2601_v51 = vsel %vm434_vm5, 1.0, %v2905_v11  ;;  %vm387_vm6 = vcmp.eq.s32.totalorder %v3115_v43, %v2934_v2  ;;  %v1796_v54 = vunpack.c.l.b16 %v1186_v34 }
 0x1b0   :  { %2252 = vmatpush.bf16.msra.mxu2 %v1989_v9  ;;  %v1997_v53 = vpack.c.b16 %v1750_v17, %v1749_v3  ;;  %v1201_v55 = vpack.c.bf16 %v2600_v46, %v2600_v46  ;;  %v1202_v56 = vpack.c.bf16 %v2601_v51, %v2601_v51  ;;  %vm388_vm7 = vcmp.eq.s32.totalorder %v3115_v43, %v2943_v7 }
 0x1b1   :  { %v2554_v57 = vsel %vm387_vm6, 1.0, %v2905_v11  ;;  %vm435_vm8 = vcmp.eq.s32.totalorder %v3117_v44, %v3318_v36  ;;  %vm436_vm9 = vcmp.eq.s32.totalorder %v3117_v44, %v3321_v37  ;;  %v2020_v58 = vpack.c.b16 %v1796_v54, %v1795_v35 }
 0x1b2   :  { %2266 = vmatpush.bf16.msra.mxu3 %v1997_v53  ;;  %v1811_v59 = vunpack.c.l.b16 %v1201_v55  ;;  %v1812_v60 = vunpack.c.l.b16 %v1202_v56  ;;  %v2555_v61 = vsel %vm388_vm7, 1.0, %v2905_v11  ;;  %v1155_v62 = vpack.c.bf16 %v2554_v57, %v2554_v57 }
 0x1b3   :  { %v1156_v63 = vpack.c.bf16 %v2555_v61, %v2555_v61  ;;  %v2602_v0 = vsel %vm435_vm8, 1.0, %v2905_v11  ;;  %v2603_v40 = vsel %vm436_vm9, 1.0, %v2905_v11  ;;  %vm465_vm10 = vcmp.eq.s32.totalorder %v3119_v45, %v3056_v10 }
 0x1b4   :  { %2287 = vmatpush.bf16.msrb.mxu2 %v2020_v58  ;;  %v2028_v1 = vpack.c.b16 %v1812_v60, %v1811_v59  ;;  %v1203_v3 = vpack.c.bf16 %v2602_v0, %v2602_v0  ;;  %v1204_v4 = vpack.c.bf16 %v2603_v40, %v2603_v40  ;;  %v1765_v5 = vunpack.c.l.b16 %v1155_v62 }
 0x1b5   :  { %v1766_v9 = vunpack.c.l.b16 %v1156_v63  ;;  %vm466_vm11 = vcmp.eq.s32.totalorder %v3119_v45, %v3059_v12  ;;  %v2632_v17 = vsel %vm465_vm10, 1.0, %v2905_v11  ;;  %vm513_vm12 = vcmp.eq.s32.totalorder %v3121_v47, %v3062_v13 }
 0x1b6   :  { %2301 = vmatpush.bf16.msrb.mxu3 %v2028_v1  ;;  %v1813_v34 = vunpack.c.l.b16 %v1203_v3  ;;  %v1814_v35 = vunpack.c.l.b16 %v1204_v4  ;;  %v2633_v46 = vsel %vm466_vm11, 1.0, %v2905_v11  ;;  %v1233_v51 = vpack.c.bf16 %v2632_v17, %v2632_v17 }
 0x1b7   :  { %v2005_v53 = vpack.c.b16 %v1766_v9, %v1765_v5  ;;  %v1234_v54 = vpack.c.bf16 %v2633_v46, %v2633_v46  ;;  %vm514_vm13 = vcmp.eq.s32.totalorder %v3121_v47, %v3065_v14  ;;  %v2680_v57 = vsel %vm513_vm12, 1.0, %v2905_v11 }
 0x1b8   :  { %v2029_v55 = vpack.c.b16 %v1814_v35, %v1813_v34  ;;  %v1843_v56 = vunpack.c.l.b16 %v1233_v51  ;;  %v2681_v58 = vsel %vm514_vm13, 1.0, %v2905_v11  ;;  %v1281_v60 = vpack.c.bf16 %v2680_v57, %v2680_v57 }
 0x1b9   :  { %2280 = vmatpush.bf16.msrb.mxu1 %v2005_v53  ;;  %v1844_v59 = vunpack.c.l.b16 %v1234_v54  ;;  %v1282_v61 = vpack.c.bf16 %v2681_v58, %v2681_v58  ;;  %vm415_vm3 = vcmp.eq.s32.totalorder %v3115_v43, %v3074_v20  ;;  %vm416_vm14 = vcmp.eq.s32.totalorder %v3115_v43, %v3077_v21 }
 0x1ba   :  { %2322 = vmatpush.bf16.msrb.mxu0 %v2029_v55  ;;  %v2582_v62 = vsel %vm415_vm3, 1.0, %v2905_v11  ;;  %vm431_vm15 = vcmp.eq.s32.totalorder %v3117_v44, %v3068_v16  ;;  %vm432_vm0 = vcmp.eq.s32.totalorder %v3117_v44, %v3071_v18  ;;  %v1891_v0 = vunpack.c.l.b16 %v1281_v60 }
 0x1bb   :  { %v2044_v63 = vpack.c.b16 %v1844_v59, %v1843_v56  ;;  %v1892_v40 = vunpack.c.l.b16 %v1282_v61  ;;  %v2583_v1 = vsel %vm416_vm14, 1.0, %v2905_v11  ;;  %v1183_v3 = vpack.c.bf16 %v2582_v62, %v2582_v62 }
 0x1bc   :  { %v1184_v4 = vpack.c.bf16 %v2583_v1, %v2583_v1  ;;  %v2598_v5 = vsel %vm431_vm15, 1.0, %v2905_v11  ;;  %v2599_v9 = vsel %vm432_vm0, 1.0, %v2905_v11  ;;  %vm463_vm1 = vcmp.eq.s32.totalorder %v3119_v45, %v3068_v16 }
 0x1bd   :  { %2329 = vmatpush.bf16.msra.mxu1 %v2044_v63  ;;  %v2068_v17 = vpack.c.b16 %v1892_v40, %v1891_v0  ;;  %v1199_v34 = vpack.c.bf16 %v2598_v5, %v2598_v5  ;;  %v1200_v35 = vpack.c.bf16 %v2599_v9, %v2599_v9  ;;  %v1793_v46 = vunpack.c.l.b16 %v1183_v3 }
 0x1be   :  { %v1794_v51 = vunpack.c.l.b16 %v1184_v4  ;;  %vm464_vm2 = vcmp.eq.s32.totalorder %v3119_v45, %v3071_v18  ;;  %v2630_v53 = vsel %vm463_vm1, 1.0, %v2905_v11  ;;  %vm511_vm4 = vcmp.eq.s32.totalorder %v3121_v47, %v3074_v20 }
 0x1bf   :  { %2371 = vmatpush.bf16.msra.mxu0 %v2068_v17  ;;  %v1809_v54 = vunpack.c.l.b16 %v1199_v34  ;;  %v1810_v55 = vunpack.c.l.b16 %v1200_v35  ;;  %v2631_v56 = vsel %vm464_vm2, 1.0, %v2905_v11  ;;  %v1231_v57 = vpack.c.bf16 %v2630_v53, %v2630_v53 }
 0x1c0   :  { %v2019_v58 = vpack.c.b16 %v1794_v51, %v1793_v46  ;;  %v1232_v59 = vpack.c.bf16 %v2631_v56, %v2631_v56  ;;  %vm512_vm5 = vcmp.eq.s32.totalorder %v3121_v47, %v3077_v21  ;;  %v2678_v62 = vsel %vm511_vm4, 1.0, %v2905_v11 }
 0x1c1   :  { %v2027_v60 = vpack.c.b16 %v1810_v55, %v1809_v54  ;;  %v1841_v61 = vunpack.c.l.b16 %v1231_v57  ;;  %v2679_v63 = vsel %vm512_vm5, 1.0, %v2905_v11  ;;  %v1279_v40 = vpack.c.bf16 %v2678_v62, %v2678_v62 }
 0x1c2   :  { %2288 = vmatpush.bf16.msrb.mxu2 %v2019_v58  ;;  %v1842_v0 = vunpack.c.l.b16 %v1232_v59  ;;  %v1280_v1 = vpack.c.bf16 %v2679_v63, %v2679_v63  ;;  %vm413_vm6 = vcmp.eq.s32.totalorder %v3115_v43, %v3088_v28  ;;  %vm414_vm7 = vcmp.eq.s32.totalorder %v3115_v43, %v3091_v30 }
 0x1c3   :  { %2302 = vmatpush.bf16.msrb.mxu3 %v2027_v60  ;;  %v2580_v3 = vsel %vm413_vm6, 1.0, %v2905_v11  ;;  %vm429_vm8 = vcmp.eq.s32.totalorder %v3117_v44, %v3082_v24  ;;  %vm430_vm9 = vcmp.eq.s32.totalorder %v3117_v44, %v3085_v26  ;;  %v1889_v5 = vunpack.c.l.b16 %v1279_v40 }
 0x1c4   :  { %v2043_v4 = vpack.c.b16 %v1842_v0, %v1841_v61  ;;  %v1890_v9 = vunpack.c.l.b16 %v1280_v1  ;;  %v2581_v17 = vsel %vm414_vm7, 1.0, %v2905_v11  ;;  %v1181_v34 = vpack.c.bf16 %v2580_v3, %v2580_v3 }
 0x1c5   :  { %v1182_v35 = vpack.c.bf16 %v2581_v17, %v2581_v17  ;;  %v2596_v46 = vsel %vm429_vm8, 1.0, %v2905_v11  ;;  %v2597_v51 = vsel %vm430_vm9, 1.0, %v2905_v11  ;;  %vm461_vm10 = vcmp.eq.s32.totalorder %v3119_v45, %v3082_v24 }
 0x1c6   :  { %2330 = vmatpush.bf16.msra.mxu1 %v2043_v4  ;;  %v2067_v53 = vpack.c.b16 %v1890_v9, %v1889_v5  ;;  %v1197_v54 = vpack.c.bf16 %v2596_v46, %v2596_v46  ;;  %v1198_v55 = vpack.c.bf16 %v2597_v51, %v2597_v51  ;;  %v1791_v56 = vunpack.c.l.b16 %v1181_v34 }
 0x1c7   :  { %v1792_v57 = vunpack.c.l.b16 %v1182_v35  ;;  %vm462_vm11 = vcmp.eq.s32.totalorder %v3119_v45, %v3085_v26  ;;  %v2628_v58 = vsel %vm461_vm10, 1.0, %v2905_v11  ;;  %vm509_vm12 = vcmp.eq.s32.totalorder %v3121_v47, %v3088_v28 }
 0x1c8   :  { %2372 = vmatpush.bf16.msra.mxu0 %v2067_v53  ;;  %v1807_v59 = vunpack.c.l.b16 %v1197_v54  ;;  %v1808_v60 = vunpack.c.l.b16 %v1198_v55  ;;  %v2629_v61 = vsel %vm462_vm11, 1.0, %v2905_v11  ;;  %v1229_v62 = vpack.c.bf16 %v2628_v58, %v2628_v58 }
 0x1c9   :  { %v2018_v63 = vpack.c.b16 %v1792_v57, %v1791_v56  ;;  %v1230_v0 = vpack.c.bf16 %v2629_v61, %v2629_v61  ;;  %vm510_vm13 = vcmp.eq.s32.totalorder %v3121_v47, %v3091_v30  ;;  %v2676_v3 = vsel %vm509_vm12, 1.0, %v2905_v11 }
 0x1ca   :  { %v2026_v40 = vpack.c.b16 %v1808_v60, %v1807_v59  ;;  %v1839_v1 = vunpack.c.l.b16 %v1229_v62  ;;  %v2677_v4 = vsel %vm510_vm13, 1.0, %v2905_v11  ;;  %v1277_v9 = vpack.c.bf16 %v2676_v3, %v2676_v3 }
 0x1cb   :  { %2289 = vmatpush.bf16.msrb.mxu2 %v2018_v63  ;;  %v1840_v5 = vunpack.c.l.b16 %v1230_v0  ;;  %v1278_v17 = vpack.c.bf16 %v2677_v4, %v2677_v4  ;;  %vm411_vm3 = vcmp.eq.s32.totalorder %v3115_v43, %v3100_v33  ;;  %vm412_vm14 = vcmp.eq.s32.totalorder %v3115_v43, %v3112_v41  ;;  %v2780_v4 = vld [vmem:[#allocation3] sm:$0xf] }
 0x1cc   :  { %2303 = vmatpush.bf16.msrb.mxu3 %v2026_v40  ;;  %v2578_v34 = vsel %vm411_vm3, 1.0, %v2905_v11  ;;  %vm427_vm15 = vcmp.eq.s32.totalorder %v3117_v44, %v3094_v31  ;;  %vm428_vm0 = vcmp.eq.s32.totalorder %v3117_v44, %v3097_v32  ;;  %v1887_v46 = vunpack.c.l.b16 %v1277_v9 }
 0x1cd   :  { %v2042_v35 = vpack.c.b16 %v1840_v5, %v1839_v1  ;;  %v1888_v51 = vunpack.c.l.b16 %v1278_v17  ;;  %v2579_v53 = vsel %vm412_vm14, 1.0, %v2905_v11  ;;  %v1179_v54 = vpack.c.bf16 %v2578_v34, %v2578_v34  ;;  %v2854_v5 = vld [vmem:[#allocation3 + $0x3c] sm:$0x10] }
 0x1ce   :  { %v1180_v55 = vpack.c.bf16 %v2579_v53, %v2579_v53  ;;  %v2594_v56 = vsel %vm427_vm15, 1.0, %v2905_v11  ;;  %v2595_v57 = vsel %vm428_vm0, 1.0, %v2905_v11  ;;  %vm459_vm1 = vcmp.eq.s32.totalorder %v3119_v45, %v3094_v31 }
 0x1cf   :  { %2331 = vmatpush.bf16.msra.mxu1 %v2042_v35  ;;  %v2066_v58 = vpack.c.b16 %v1888_v51, %v1887_v46  ;;  %v1195_v59 = vpack.c.bf16 %v2594_v56, %v2594_v56  ;;  %v1196_v60 = vpack.c.bf16 %v2595_v57, %v2595_v57  ;;  %v1789_v61 = vunpack.c.l.b16 %v1179_v54 }
 0x1d0   :  { %v1790_v62 = vunpack.c.l.b16 %v1180_v55  ;;  %vm460_vm2 = vcmp.eq.s32.totalorder %v3119_v45, %v3097_v32  ;;  %v2626_v63 = vsel %vm459_vm1, 1.0, %v2905_v11  ;;  %vm507_vm4 = vcmp.eq.s32.totalorder %v3121_v47, %v3100_v33 }
 0x1d1   :  { %2373 = vmatpush.bf16.msra.mxu0 %v2066_v58  ;;  %v1805_v0 = vunpack.c.l.b16 %v1195_v59  ;;  %v1806_v40 = vunpack.c.l.b16 %v1196_v60  ;;  %v2627_v1 = vsel %vm460_vm2, 1.0, %v2905_v11  ;;  %v1227_v3 = vpack.c.bf16 %v2626_v63, %v2626_v63 }
 0x1d2   :  { %v2017_v9 = vpack.c.b16 %v1790_v62, %v1789_v61  ;;  %v1228_v17 = vpack.c.bf16 %v2627_v1, %v2627_v1  ;;  %vm508_vm5 = vcmp.eq.s32.totalorder %v3121_v47, %v3112_v41  ;;  %v2674_v46 = vsel %vm507_vm4, 1.0, %v2905_v11  ;;  %v2846_v61 = vld [vmem:[#allocation3 + $0x4] sm:$0xf] }
 0x1d3   :  { %v2025_v34 = vpack.c.b16 %v1806_v40, %v1805_v0  ;;  %v1837_v35 = vunpack.c.l.b16 %v1227_v3  ;;  %v2675_v51 = vsel %vm508_vm5, 1.0, %v2905_v11  ;;  %v1275_v54 = vpack.c.bf16 %v2674_v46, %v2674_v46  ;;  %v2782_v62 = vld [vmem:[#allocation3 + $0x40] sm:$0x10] }
 0x1d4   :  { %2290 = vmatpush.bf16.msrb.mxu2 %v2017_v9  ;;  %v1838_v53 = vunpack.c.l.b16 %v1228_v17  ;;  %v1276_v55 = vpack.c.bf16 %v2675_v51, %v2675_v51  ;;  %v2781_v56 = vor.u32 %v2854_v5, %v2780_v4  ;;  %vm409_vm6 = vcmp.eq.s32.totalorder %v3115_v43, %v3229_v6 }
 0x1d5   :  { %2304 = vmatpush.bf16.msrb.mxu3 %v2025_v34  ;;  %vm410_vm7 = vcmp.eq.s32.totalorder %v3115_v43, %v3232_v8  ;;  %vm425_vm8 = vcmp.eq.s32.totalorder %v3117_v44, %v3017_v27  ;;  %vm426_vm9 = vcmp.eq.s32.totalorder %v3117_v44, %v3026_v29  ;;  %v1885_v58 = vunpack.c.l.b16 %v1275_v54 }
 0x1d6   :  { %v2041_v57 = vpack.c.b16 %v1838_v53, %v1837_v35  ;;  %v1886_v59 = vunpack.c.l.b16 %v1276_v55  ;;  %2253 = vmatmul.bf16.vlgmr.msra.gmra.mxu2 %v2781_v56  ;;  %v2576_v60 = vsel %vm409_vm6, 1.0, %v2905_v11  ;;  %v2577_v63 = vsel %vm410_vm7, 1.0, %v2905_v11 }
 0x1d7   :  { %v1177_v0 = vpack.c.bf16 %v2576_v60, %v2576_v60  ;;  %v2592_v40 = vsel %vm425_vm8, 1.0, %v2905_v11  ;;  %v2593_v1 = vsel %vm426_vm9, 1.0, %v2905_v11  ;;  %v1178_v4 = vpack.c.bf16 %v2577_v63, %v2577_v63 }
 0x1d8   :  { %2332 = vmatpush.bf16.msra.mxu1 %v2041_v57  ;;  %v2065_v3 = vpack.c.b16 %v1886_v59, %v1885_v58  ;;  %v1193_v5 = vpack.c.bf16 %v2592_v40, %v2592_v40  ;;  %v1194_v9 = vpack.c.bf16 %v2593_v1, %v2593_v1  ;;  %v2785_v34 = vor.u32 %v2846_v61, %v2782_v62 }
 0x1d9   :  { %v1787_v17 = vunpack.c.l.b16 %v1177_v0  ;;  %vm457_vm10 = vcmp.eq.s32.totalorder %v3119_v45, %v3017_v27  ;;  %vm458_vm11 = vcmp.eq.s32.totalorder %v3119_v45, %v3026_v29  ;;  %v1788_v35 = vunpack.c.l.b16 %v1178_v4 }
 0x1da   :  { %2374 = vmatpush.bf16.msra.mxu0 %v2065_v3  ;;  %v1803_v46 = vunpack.c.l.b16 %v1193_v5  ;;  %v1804_v51 = vunpack.c.l.b16 %v1194_v9  ;;  %v2624_v53 = vsel %vm457_vm10, 1.0, %v2905_v11  ;;  %2267 = vmatmul.bf16.vlgmr.msra.gmra.mxu3 %v2785_v34  ;;  %v2625_v54 = vsel %vm458_vm11, 1.0, %v2905_v11 }
 0x1db   :  { %v1225_v55 = vpack.c.bf16 %v2624_v53, %v2624_v53  ;;  %vm505_vm12 = vcmp.eq.s32.totalorder %v3121_v47, %v3229_v6  ;;  %vm506_vm13 = vcmp.eq.s32.totalorder %v3121_v47, %v3232_v8  ;;  %v2016_v56 = vpack.c.b16 %v1788_v35, %v1787_v17 }
 0x1dc   :  { %v2024_v57 = vpack.c.b16 %v1804_v51, %v1803_v46  ;;  %v1226_v58 = vpack.c.bf16 %v2625_v54, %v2625_v54  ;;  %v2672_v59 = vsel %vm505_vm12, 1.0, %v2905_v11  ;;  %v2673_v61 = vsel %vm506_vm13, 1.0, %v2905_v11 }
 0x1dd   :  { %v1835_v60 = vunpack.c.l.b16 %v1225_v55  ;;  %v1273_v62 = vpack.c.bf16 %v2672_v59, %v2672_v59  ;;  %vm407_vm3 = vcmp.eq.s32.totalorder %v3115_v43, %v3260_v38  ;;  %2291 = vmatpush.bf16.msrb.mxu2 %v2016_v56  ;;  %v1274_v0 = vpack.c.bf16 %v2673_v61, %v2673_v61 }
 0x1de   :  { %2305 = vmatpush.bf16.msrb.mxu3 %v2024_v57  ;;  %v1836_v63 = vunpack.c.l.b16 %v1226_v58  ;;  %vm408_vm14 = vcmp.eq.s32.totalorder %v3115_v43, %v3263_v39  ;;  %v2574_v40 = vsel %vm407_vm3, 1.0, %v2905_v11  ;;  %vm423_vm15 = vcmp.eq.s32.totalorder %v3117_v44, %v2996_v22 }
 0x1df   :  { %v1883_v1 = vunpack.c.l.b16 %v1273_v62  ;;  %v2575_v3 = vsel %vm408_vm14, 1.0, %v2905_v11  ;;  %v1175_v4 = vpack.c.bf16 %v2574_v40, %v2574_v40  ;;  %v1884_v9 = vunpack.c.l.b16 %v1274_v0 }
 0x1e0   :  { %v2040_v5 = vpack.c.b16 %v1836_v63, %v1835_v60  ;;  %v1176_v17 = vpack.c.bf16 %v2575_v3, %v2575_v3  ;;  %vm424_vm0 = vcmp.eq.s32.totalorder %v3117_v44, %v3008_v25  ;;  %v2590_v35 = vsel %vm423_vm15, 1.0, %v2905_v11 }
 0x1e1   :  { %v1785_v34 = vunpack.c.l.b16 %v1175_v4  ;;  %v2591_v46 = vsel %vm424_vm0, 1.0, %v2905_v11  ;;  %vm455_vm1 = vcmp.eq.s32.totalorder %v3119_v45, %v2996_v22  ;;  %v2064_v51 = vpack.c.b16 %v1884_v9, %v1883_v1 }
 0x1e2   :  { %2333 = vmatpush.bf16.msra.mxu1 %v2040_v5  ;;  %v1786_v53 = vunpack.c.l.b16 %v1176_v17  ;;  %v1191_v54 = vpack.c.bf16 %v2590_v35, %v2590_v35  ;;  %v1192_v55 = vpack.c.bf16 %v2591_v46, %v2591_v46  ;;  %vm456_vm2 = vcmp.eq.s32.totalorder %v3119_v45, %v3008_v25 }
 0x1e3   :  { %v2622_v56 = vsel %vm455_vm1, 1.0, %v2905_v11  ;;  %vm503_vm4 = vcmp.eq.s32.totalorder %v3121_v47, %v3260_v38  ;;  %vm504_vm5 = vcmp.eq.s32.totalorder %v3121_v47, %v3263_v39  ;;  %2375 = vmatpush.bf16.msra.mxu0 %v2064_v51  ;;  %v2623_v60 = vsel %vm456_vm2, 1.0, %v2905_v11 }
 0x1e4   :  { %v2015_v57 = vpack.c.b16 %v1786_v53, %v1785_v34  ;;  %v1801_v58 = vunpack.c.l.b16 %v1191_v54  ;;  %v1802_v59 = vunpack.c.l.b16 %v1192_v55  ;;  %v1223_v61 = vpack.c.bf16 %v2622_v56, %v2622_v56 }
 0x1e5   :  { %v1224_v62 = vpack.c.bf16 %v2623_v60, %v2623_v60  ;;  %v2670_v63 = vsel %vm503_vm4, 1.0, %v2905_v11  ;;  %v2671_v0 = vsel %vm504_vm5, 1.0, %v2905_v11  ;;  %vm405_vm6 = vcmp.eq.s32.totalorder %v3115_v43, %v3290_v50 }
 0x1e6   :  { %2292 = vmatpush.bf16.msrb.mxu2 %v2015_v57  ;;  %v2023_v40 = vpack.c.b16 %v1802_v59, %v1801_v58  ;;  %v1271_v1 = vpack.c.bf16 %v2670_v63, %v2670_v63  ;;  %v1272_v3 = vpack.c.bf16 %v2671_v0, %v2671_v0  ;;  %v1833_v4 = vunpack.c.l.b16 %v1223_v61  ;;  %v2855_v63 = vld [vmem:[#allocation3 + $0x44] sm:$0x10] }
 0x1e7   :  { %v1834_v5 = vunpack.c.l.b16 %v1224_v62  ;;  %vm406_vm7 = vcmp.eq.s32.totalorder %v3115_v43, %v3293_v52  ;;  %v2572_v9 = vsel %vm405_vm6, 1.0, %v2905_v11  ;;  %vm421_vm8 = vcmp.eq.s32.totalorder %v3117_v44, %v2969_v15  ;;  %v2788_v62 = vld [vmem:[#allocation3 + $0x8] sm:$0xf] }
 0x1e8   :  { %2306 = vmatpush.bf16.msrb.mxu3 %v2023_v40  ;;  %v1881_v17 = vunpack.c.l.b16 %v1271_v1  ;;  %v1882_v34 = vunpack.c.l.b16 %v1272_v3  ;;  %v2573_v35 = vsel %vm406_vm7, 1.0, %v2905_v11  ;;  %v1173_v46 = vpack.c.bf16 %v2572_v9, %v2572_v9 }
 0x1e9   :  { %v2039_v51 = vpack.c.b16 %v1834_v5, %v1833_v4  ;;  %v1174_v53 = vpack.c.bf16 %v2573_v35, %v2573_v35  ;;  %vm422_vm9 = vcmp.eq.s32.totalorder %v3117_v44, %v2984_v19  ;;  %v2588_v56 = vsel %vm421_vm8, 1.0, %v2905_v11 }
 0x1ea   :  { %v2063_v54 = vpack.c.b16 %v1882_v34, %v1881_v17  ;;  %v1783_v55 = vunpack.c.l.b16 %v1173_v46  ;;  %v2589_v57 = vsel %vm422_vm9, 1.0, %v2905_v11  ;;  %v1189_v59 = vpack.c.bf16 %v2588_v56, %v2588_v56 }
 0x1eb   :  { %2334 = vmatpush.bf16.msra.mxu1 %v2039_v51  ;;  %v1784_v58 = vunpack.c.l.b16 %v1174_v53  ;;  %v1190_v60 = vpack.c.bf16 %v2589_v57, %v2589_v57  ;;  %vm453_vm10 = vcmp.eq.s32.totalorder %v3119_v45, %v2969_v15  ;;  %vm454_vm11 = vcmp.eq.s32.totalorder %v3119_v45, %v2984_v19 }
 0x1ec   :  { %2376 = vmatpush.bf16.msra.mxu0 %v2063_v54  ;;  %v2620_v61 = vsel %vm453_vm10, 1.0, %v2905_v11  ;;  %vm501_vm12 = vcmp.eq.s32.totalorder %v3121_v47, %v3290_v50  ;;  %vm502_vm13 = vcmp.eq.s32.totalorder %v3121_v47, %v3293_v52  ;;  %v1799_v40 = vunpack.c.l.b16 %v1189_v59 }
 0x1ed   :  { %v2014_v0 = vpack.c.b16 %v1784_v58, %v1783_v55  ;;  %v1800_v1 = vunpack.c.l.b16 %v1190_v60  ;;  %v2621_v3 = vsel %vm454_vm11, 1.0, %v2905_v11  ;;  %v1221_v4 = vpack.c.bf16 %v2620_v61, %v2620_v61 }
 0x1ee   :  { %v1222_v5 = vpack.c.bf16 %v2621_v3, %v2621_v3  ;;  %v2668_v9 = vsel %vm501_vm12, 1.0, %v2905_v11  ;;  %v2669_v17 = vsel %vm502_vm13, 1.0, %v2905_v11  ;;  %v2789_v51 = vor.u32 %v2855_v63, %v2788_v62 }
 0x1ef   :  { %2293 = vmatpush.bf16.msrb.mxu2 %v2014_v0  ;;  %v2022_v34 = vpack.c.b16 %v1800_v1, %v1799_v40  ;;  %v1269_v35 = vpack.c.bf16 %v2668_v9, %v2668_v9  ;;  %v1270_v46 = vpack.c.bf16 %v2669_v17, %v2669_v17  ;;  %v1831_v53 = vunpack.c.l.b16 %v1221_v4 }
 0x1f0   :  { %v1832_v54 = vunpack.c.l.b16 %v1222_v5  ;;  %vm403_vm3 = vcmp.eq.s32.totalorder %v3115_v43, %v3318_v36  ;;  %vm404_vm14 = vcmp.eq.s32.totalorder %v3115_v43, %v3321_v37  ;;  %2281 = vmatmul.bf16.vlgmr.msrb.gmra.mxu1 %v2789_v51  ;;  %vm419_vm15 = vcmp.eq.s32.totalorder %v3117_v44, %v2934_v2 }
 0x1f1   :  { %2307 = vmatpush.bf16.msrb.mxu3 %v2022_v34  ;;  %v1879_v55 = vunpack.c.l.b16 %v1269_v35  ;;  %v1880_v56 = vunpack.c.l.b16 %v1270_v46  ;;  %v2570_v57 = vsel %vm403_vm3, 1.0, %v2905_v11  ;;  %v2571_v58 = vsel %vm404_vm14, 1.0, %v2905_v11 }
 0x1f2   :  { %v2038_v59 = vpack.c.b16 %v1832_v54, %v1831_v53  ;;  %v1171_v60 = vpack.c.bf16 %v2570_v57, %v2570_v57  ;;  %v1172_v61 = vpack.c.bf16 %v2571_v58, %v2571_v58  ;;  %vm420_vm0 = vcmp.eq.s32.totalorder %v3117_v44, %v2943_v7 }
 0x1f3   :  { %v2062_v62 = vpack.c.b16 %v1880_v56, %v1879_v55  ;;  %v2586_v43 = vsel %vm419_vm15, 1.0, %v2905_v11  ;;  %vm481_vm1 = vcmp.eq.s32.totalorder %v3119_v45, %v3062_v13  ;;  %v2587_v40 = vsel %vm420_vm0, 1.0, %v2905_v11  ;;  %v2847_v55 = vld [vmem:[#allocation3 + $0xc] sm:$0xf] }
 0x1f4   :  { %2335 = vmatpush.bf16.msra.mxu1 %v2038_v59  ;;  %v1781_v63 = vunpack.c.l.b16 %v1171_v60  ;;  %v1782_v0 = vunpack.c.l.b16 %v1172_v61  ;;  %v1187_v1 = vpack.c.bf16 %v2586_v43, %v2586_v43  ;;  %v1188_v3 = vpack.c.bf16 %v2587_v40, %v2587_v40  ;;  %v2790_v59 = vld [vmem:[#allocation3 + $0x48] sm:$0x10]  ;;  %v2848_v60 = vld [vmem:[#allocation3 + $0x14] sm:$0xf] }
 0x1f5   :  { %2377 = vmatpush.bf16.msra.mxu0 %v2062_v62  ;;  %vm482_vm2 = vcmp.eq.s32.totalorder %v3119_v45, %v3065_v14  ;;  %v2648_v4 = vsel %vm481_vm1, 1.0, %v2905_v11  ;;  %vm497_vm4 = vcmp.eq.s32.totalorder %v3121_v47, %v3056_v10  ;;  %vm498_vm5 = vcmp.eq.s32.totalorder %v3121_v47, %v3059_v12  ;;  %v2798_v61 = vld [vmem:[#allocation3 + $0x50] sm:$0x10] }
 0x1f6   :  { %v2013_v44 = vpack.c.b16 %v1782_v0, %v1781_v63  ;;  %v1797_v5 = vunpack.c.l.b16 %v1187_v1  ;;  %v2649_v9 = vsel %vm482_vm2, 1.0, %v2905_v11  ;;  %v1249_v17 = vpack.c.bf16 %v2648_v4, %v2648_v4 }
 0x1f7   :  { %v1798_v34 = vunpack.c.l.b16 %v1188_v3  ;;  %v1250_v35 = vpack.c.bf16 %v2649_v9, %v2649_v9  ;;  %v2664_v46 = vsel %vm497_vm4, 1.0, %v2905_v11  ;;  %v2665_v53 = vsel %vm498_vm5, 1.0, %v2905_v11 }
 0x1f8   :  { %2294 = vmatpush.bf16.msrb.mxu2 %v2013_v44  ;;  %v1859_v51 = vunpack.c.l.b16 %v1249_v17  ;;  %v1265_v54 = vpack.c.bf16 %v2664_v46, %v2664_v46  ;;  %vm451_vm6 = vcmp.eq.s32.totalorder %v3119_v45, %v2934_v2  ;;  %v1266_v58 = vpack.c.bf16 %v2665_v53, %v2665_v53 }
 0x1f9   :  { %v2021_v56 = vpack.c.b16 %v1798_v34, %v1797_v5  ;;  %v1860_v57 = vunpack.c.l.b16 %v1250_v35  ;;  %vm452_vm7 = vcmp.eq.s32.totalorder %v3119_v45, %v2943_v7  ;;  %v2618_v43 = vsel %vm451_vm6, 1.0, %v2905_v11 }
 0x1fa   :  { %v1875_v62 = vunpack.c.l.b16 %v1265_v54  ;;  %v2619_v63 = vsel %vm452_vm7, 1.0, %v2905_v11  ;;  %vm499_vm8 = vcmp.eq.s32.totalorder %v3121_v47, %v3318_v36  ;;  %v1876_v40 = vunpack.c.l.b16 %v1266_v58  ;;  %v2796_v54 = vld [vmem:[#allocation3 + $0x10] sm:$0xf] }
 0x1fb   :  { %2308 = vmatpush.bf16.msrb.mxu3 %v2021_v56  ;;  %v2052_v0 = vpack.c.b16 %v1860_v57, %v1859_v51  ;;  %v1219_v1 = vpack.c.bf16 %v2618_v43, %v2618_v43  ;;  %v1220_v3 = vpack.c.bf16 %v2619_v63, %v2619_v63  ;;  %vm500_vm9 = vcmp.eq.s32.totalorder %v3121_v47, %v3321_v37 }
 0x1fc   :  { %v2666_v4 = vsel %vm499_vm8, 1.0, %v2905_v11  ;;  %v2793_v44 = vor.u32 %v2847_v55, %v2790_v59  ;;  %v2801_v5 = vor.u32 %v2848_v60, %v2798_v61  ;;  %v2060_v9 = vpack.c.b16 %v1876_v40, %v1875_v62  ;;  %v2856_v55 = vld [vmem:[#allocation3 + $0x4c] sm:$0x10] }
 0x1fd   :  { %2343 = vmatpush.bf16.msra.mxu2 %v2052_v0  ;;  %v1829_v17 = vunpack.c.l.b16 %v1219_v1  ;;  %v1830_v34 = vunpack.c.l.b16 %v1220_v3  ;;  %v2667_v35 = vsel %vm500_vm9, 1.0, %v2905_v11  ;;  %v3549_v46 = vperm.slane %v346_v42, 0 }
 0x1fe   :  { %v1267_v51 = vpack.c.bf16 %v2666_v4, %v2666_v4  ;;  %v1268_v53 = vpack.c.bf16 %v2667_v35, %v2667_v35  ;;  %2295 = vmatmul.bf16.vlgmr.msrb.gmra.mxu2 %v2793_v44  ;;  %2323 = vmatmul.bf16.vlgmr.msrb.gmra.mxu0 %v2801_v5  ;;  %vm529_vm10 = vcmp.eq.s32.totalorder %v3123_v48, %v3056_v10 }
 0x1ff   :  { %2357 = vmatpush.bf16.msra.mxu3 %v2060_v9  ;;  %v2037_v56 = vpack.c.b16 %v1830_v34, %v1829_v17  ;;  %vm530_vm11 = vcmp.eq.s32.totalorder %v3123_v48, %v3059_v12  ;;  %v2696_v57 = vsel %vm529_vm10, 1.0, %v2905_v11  ;;  %vm577_vm12 = vcmp.eq.s32.totalorder %v3125_v49, %v3062_v13 }
 0x200   :  { %v1877_v23 = vunpack.c.l.b16 %v1267_v51  ;;  %v1878_v42 = vunpack.c.l.b16 %v1268_v53  ;;  %v2697_v58 = vsel %vm530_vm11, 1.0, %v2905_v11  ;;  %v1297_v59 = vpack.c.bf16 %v2696_v57, %v2696_v57 }
 0x201   :  { %2336 = vmatpush.bf16.msra.mxu1 %v2037_v56  ;;  %v1298_v60 = vpack.c.bf16 %v2697_v58, %v2697_v58  ;;  %vm578_vm13 = vcmp.eq.s32.totalorder %v3125_v49, %v3065_v14  ;;  %v2744_v61 = vsel %vm577_vm12, 1.0, %v2905_v11  ;;  %v2797_v62 = vor.u32 %v2856_v55, %v2796_v54 }
 0x202   :  { %v2061_v43 = vpack.c.b16 %v1878_v42, %v1877_v23  ;;  %v1907_v63 = vunpack.c.l.b16 %v1297_v59  ;;  %v2745_v0 = vsel %vm578_vm13, 1.0, %v2905_v11  ;;  %v1345_v40 = vpack.c.bf16 %v2744_v61, %v2744_v61 }
 0x203   :  { %v1908_v1 = vunpack.c.l.b16 %v1298_v60  ;;  %v1346_v3 = vpack.c.bf16 %v2745_v0, %v2745_v0  ;;  %2309 = vmatmul.bf16.vlgmr.msrb.gmra.mxu3 %v2797_v62  ;;  %vm479_vm3 = vcmp.eq.s32.totalorder %v3119_v45, %v3074_v20  ;;  %vm480_vm14 = vcmp.eq.s32.totalorder %v3119_v45, %v3077_v21 }
 0x204   :  { %2378 = vmatpush.bf16.msra.mxu0 %v2061_v43  ;;  %v1955_v4 = vunpack.c.l.b16 %v1345_v40  ;;  %v2646_v44 = vsel %vm479_vm3, 1.0, %v2905_v11  ;;  %v2647_v5 = vsel %vm480_vm14, 1.0, %v2905_v11  ;;  %vm495_vm15 = vcmp.eq.s32.totalorder %v3121_v47, %v3068_v16 }
 0x205   :  { %v2076_v9 = vpack.c.b16 %v1908_v1, %v1907_v63  ;;  %v1956_v17 = vunpack.c.l.b16 %v1346_v3  ;;  %v1247_v34 = vpack.c.bf16 %v2646_v44, %v2646_v44  ;;  %v1248_v35 = vpack.c.bf16 %v2647_v5, %v2647_v5 }
 0x206   :  { %vm496_vm0 = vcmp.eq.s32.totalorder %v3121_v47, %v3071_v18  ;;  %v2662_v51 = vsel %vm495_vm15, 1.0, %v2905_v11  ;;  %vm527_vm1 = vcmp.eq.s32.totalorder %v3123_v48, %v3068_v16  ;;  %vm528_vm2 = vcmp.eq.s32.totalorder %v3123_v48, %v3071_v18 }
 0x207   :  { %2385 = vmatpush.bf16.msrb.mxu1 %v2076_v9  ;;  %v2100_v53 = vpack.c.b16 %v1956_v17, %v1955_v4  ;;  %v1857_v54 = vunpack.c.l.b16 %v1247_v34  ;;  %v1858_v55 = vunpack.c.l.b16 %v1248_v35  ;;  %v2663_v56 = vsel %vm496_vm0, 1.0, %v2905_v11 }
 0x208   :  { %v1263_v57 = vpack.c.bf16 %v2662_v51, %v2662_v51  ;;  %v1264_v23 = vpack.c.bf16 %v2663_v56, %v2663_v56  ;;  %v2694_v42 = vsel %vm527_vm1, 1.0, %v2905_v11  ;;  %v2695_v58 = vsel %vm528_vm2, 1.0, %v2905_v11 }
 0x209   :  { %2427 = vmatpush.bf16.msrb.mxu0 %v2100_v53  ;;  %v2051_v59 = vpack.c.b16 %v1858_v55, %v1857_v54  ;;  %v1295_v60 = vpack.c.bf16 %v2694_v42, %v2694_v42  ;;  %v1296_v61 = vpack.c.bf16 %v2695_v58, %v2695_v58  ;;  %vm575_vm4 = vcmp.eq.s32.totalorder %v3125_v49, %v3074_v20 }
 0x20a   :  { %v1873_v62 = vunpack.c.l.b16 %v1263_v57  ;;  %v1874_v43 = vunpack.c.l.b16 %v1264_v23  ;;  %vm576_vm5 = vcmp.eq.s32.totalorder %v3125_v49, %v3077_v21  ;;  %v2742_v63 = vsel %vm575_vm4, 1.0, %v2905_v11 }
 0x20b   :  { %2344 = vmatpush.bf16.msra.mxu2 %v2051_v59  ;;  %v1905_v0 = vunpack.c.l.b16 %v1295_v60  ;;  %v1906_v40 = vunpack.c.l.b16 %v1296_v61  ;;  %v2743_v1 = vsel %vm576_vm5, 1.0, %v2905_v11  ;;  %v1343_v3 = vpack.c.bf16 %v2742_v63, %v2742_v63 }
 0x20c   :  { %v2059_v4 = vpack.c.b16 %v1874_v43, %v1873_v62  ;;  %v1344_v44 = vpack.c.bf16 %v2743_v1, %v2743_v1  ;;  %vm477_vm6 = vcmp.eq.s32.totalorder %v3119_v45, %v3088_v28  ;;  %vm478_vm7 = vcmp.eq.s32.totalorder %v3119_v45, %v3091_v30 }
 0x20d   :  { %v2075_v5 = vpack.c.b16 %v1906_v40, %v1905_v0  ;;  %v1953_v9 = vunpack.c.l.b16 %v1343_v3  ;;  %v2644_v17 = vsel %vm477_vm6, 1.0, %v2905_v11  ;;  %v2645_v34 = vsel %vm478_vm7, 1.0, %v2905_v11 }
 0x20e   :  { %2358 = vmatpush.bf16.msra.mxu3 %v2059_v4  ;;  %v1954_v35 = vunpack.c.l.b16 %v1344_v44  ;;  %v1245_v51 = vpack.c.bf16 %v2644_v17, %v2644_v17  ;;  %v1246_v53 = vpack.c.bf16 %v2645_v34, %v2645_v34  ;;  %vm493_vm8 = vcmp.eq.s32.totalorder %v3121_v47, %v3082_v24  ;;  %v2804_v17 = vld [vmem:[#allocation3 + $0x18] sm:$0xf] }
 0x20f   :  { %2386 = vmatpush.bf16.msrb.mxu1 %v2075_v5  ;;  %vm494_vm9 = vcmp.eq.s32.totalorder %v3121_v47, %v3085_v26  ;;  %v2660_v54 = vsel %vm493_vm8, 1.0, %v2905_v11  ;;  %vm525_vm10 = vcmp.eq.s32.totalorder %v3123_v48, %v3082_v24  ;;  %vm526_vm11 = vcmp.eq.s32.totalorder %v3123_v48, %v3085_v26  ;;  %v2857_v34 = vld [vmem:[#allocation3 + $0x54] sm:$0x10] }
 0x210   :  { %v2099_v55 = vpack.c.b16 %v1954_v35, %v1953_v9  ;;  %v1855_v56 = vunpack.c.l.b16 %v1245_v51  ;;  %v1856_v57 = vunpack.c.l.b16 %v1246_v53  ;;  %v2661_v23 = vsel %vm494_vm9, 1.0, %v2905_v11 }
 0x211   :  { %v1261_v42 = vpack.c.bf16 %v2660_v54, %v2660_v54  ;;  %v1262_v58 = vpack.c.bf16 %v2661_v23, %v2661_v23  ;;  %v2692_v59 = vsel %vm525_vm10, 1.0, %v2905_v11  ;;  %v2693_v60 = vsel %vm526_vm11, 1.0, %v2905_v11 }
 0x212   :  { %2428 = vmatpush.bf16.msrb.mxu0 %v2099_v55  ;;  %v2050_v61 = vpack.c.b16 %v1856_v57, %v1855_v56  ;;  %v1293_v62 = vpack.c.bf16 %v2692_v59, %v2692_v59  ;;  %v1294_v43 = vpack.c.bf16 %v2693_v60, %v2693_v60  ;;  %vm573_vm12 = vcmp.eq.s32.totalorder %v3125_v49, %v3088_v28 }
 0x213   :  { %v1871_v63 = vunpack.c.l.b16 %v1261_v42  ;;  %v1872_v0 = vunpack.c.l.b16 %v1262_v58  ;;  %vm574_vm13 = vcmp.eq.s32.totalorder %v3125_v49, %v3091_v30  ;;  %v2740_v40 = vsel %vm573_vm12, 1.0, %v2905_v11 }
 0x214   :  { %2345 = vmatpush.bf16.msra.mxu2 %v2050_v61  ;;  %v1903_v1 = vunpack.c.l.b16 %v1293_v62  ;;  %v1904_v3 = vunpack.c.l.b16 %v1294_v43  ;;  %v2741_v4 = vsel %vm574_vm13, 1.0, %v2905_v11  ;;  %v1341_v44 = vpack.c.bf16 %v2740_v40, %v2740_v40 }
 0x215   :  { %v2058_v5 = vpack.c.b16 %v1872_v0, %v1871_v63  ;;  %v1342_v9 = vpack.c.bf16 %v2741_v4, %v2741_v4  ;;  %vm475_vm3 = vcmp.eq.s32.totalorder %v3119_v45, %v3100_v33  ;;  %vm476_vm14 = vcmp.eq.s32.totalorder %v3119_v45, %v3112_v41 }
 0x216   :  { %v2074_v35 = vpack.c.b16 %v1904_v3, %v1903_v1  ;;  %v1951_v51 = vunpack.c.l.b16 %v1341_v44  ;;  %v2642_v53 = vsel %vm475_vm3, 1.0, %v2905_v11  ;;  %v2643_v54 = vsel %vm476_vm14, 1.0, %v2905_v11 }
 0x217   :  { %2359 = vmatpush.bf16.msra.mxu3 %v2058_v5  ;;  %v1952_v55 = vunpack.c.l.b16 %v1342_v9  ;;  %v1243_v56 = vpack.c.bf16 %v2642_v53, %v2642_v53  ;;  %v1244_v57 = vpack.c.bf16 %v2643_v54, %v2643_v54  ;;  %vm491_vm15 = vcmp.eq.s32.totalorder %v3121_v47, %v3094_v31 }
 0x218   :  { %2387 = vmatpush.bf16.msrb.mxu1 %v2074_v35  ;;  %vm492_vm0 = vcmp.eq.s32.totalorder %v3121_v47, %v3097_v32  ;;  %v2658_v23 = vsel %vm491_vm15, 1.0, %v2905_v11  ;;  %v2805_v42 = vor.u32 %v2857_v34, %v2804_v17  ;;  %vm523_vm1 = vcmp.eq.s32.totalorder %v3123_v48, %v3094_v31 }
 0x219   :  { %v2098_v58 = vpack.c.b16 %v1952_v55, %v1951_v51  ;;  %v1853_v59 = vunpack.c.l.b16 %v1243_v56  ;;  %v1854_v60 = vunpack.c.l.b16 %v1244_v57  ;;  %v2659_v61 = vsel %vm492_vm0, 1.0, %v2905_v11 }
 0x21a   :  { %v1259_v62 = vpack.c.bf16 %v2658_v23, %v2658_v23  ;;  %v1260_v43 = vpack.c.bf16 %v2659_v61, %v2659_v61  ;;  %2337 = vmatmul.bf16.vlgmr.msra.gmra.mxu1 %v2805_v42  ;;  %vm524_vm2 = vcmp.eq.s32.totalorder %v3123_v48, %v3097_v32  ;;  %v2690_v63 = vsel %vm523_vm1, 1.0, %v2905_v11 }
 0x21b   :  { %2429 = vmatpush.bf16.msrb.mxu0 %v2098_v58  ;;  %v2049_v0 = vpack.c.b16 %v1854_v60, %v1853_v59  ;;  %v2691_v40 = vsel %vm524_vm2, 1.0, %v2905_v11  ;;  %v1291_v1 = vpack.c.bf16 %v2690_v63, %v2690_v63  ;;  %vm571_vm4 = vcmp.eq.s32.totalorder %v3125_v49, %v3100_v33 }
 0x21c   :  { %v1869_v3 = vunpack.c.l.b16 %v1259_v62  ;;  %v1870_v4 = vunpack.c.l.b16 %v1260_v43  ;;  %v1292_v44 = vpack.c.bf16 %v2691_v40, %v2691_v40  ;;  %vm572_vm5 = vcmp.eq.s32.totalorder %v3125_v49, %v3112_v41 }
 0x21d   :  { %2346 = vmatpush.bf16.msra.mxu2 %v2049_v0  ;;  %v1901_v5 = vunpack.c.l.b16 %v1291_v1  ;;  %v2738_v9 = vsel %vm571_vm4, 1.0, %v2905_v11  ;;  %v2739_v17 = vsel %vm572_vm5, 1.0, %v2905_v11  ;;  %vm473_vm6 = vcmp.eq.s32.totalorder %v3119_v45, %v3229_v6 }
 0x21e   :  { %v2057_v34 = vpack.c.b16 %v1870_v4, %v1869_v3  ;;  %v1902_v35 = vunpack.c.l.b16 %v1292_v44  ;;  %v1339_v51 = vpack.c.bf16 %v2738_v9, %v2738_v9  ;;  %v1340_v53 = vpack.c.bf16 %v2739_v17, %v2739_v17 }
 0x21f   :  { %vm474_vm7 = vcmp.eq.s32.totalorder %v3119_v45, %v3232_v8  ;;  %v2640_v54 = vsel %vm473_vm6, 1.0, %v2905_v11  ;;  %vm489_vm8 = vcmp.eq.s32.totalorder %v3121_v47, %v3017_v27  ;;  %vm490_vm9 = vcmp.eq.s32.totalorder %v3121_v47, %v3026_v29 }
 0x220   :  { %2360 = vmatpush.bf16.msra.mxu3 %v2057_v34  ;;  %v2073_v55 = vpack.c.b16 %v1902_v35, %v1901_v5  ;;  %v1949_v56 = vunpack.c.l.b16 %v1339_v51  ;;  %v1950_v57 = vunpack.c.l.b16 %v1340_v53  ;;  %v2641_v23 = vsel %vm474_vm7, 1.0, %v2905_v11 }
 0x221   :  { %v1241_v42 = vpack.c.bf16 %v2640_v54, %v2640_v54  ;;  %v1242_v58 = vpack.c.bf16 %v2641_v23, %v2641_v23  ;;  %v2656_v59 = vsel %vm489_vm8, 1.0, %v2905_v11  ;;  %v2657_v60 = vsel %vm490_vm9, 1.0, %v2905_v11 }
 0x222   :  { %2388 = vmatpush.bf16.msrb.mxu1 %v2073_v55  ;;  %v2097_v61 = vpack.c.b16 %v1950_v57, %v1949_v56  ;;  %v1257_v62 = vpack.c.bf16 %v2656_v59, %v2656_v59  ;;  %v1258_v43 = vpack.c.bf16 %v2657_v60, %v2657_v60  ;;  %vm521_vm10 = vcmp.eq.s32.totalorder %v3123_v48, %v3017_v27 }
 0x223   :  { %v1851_v63 = vunpack.c.l.b16 %v1241_v42  ;;  %v1852_v0 = vunpack.c.l.b16 %v1242_v58  ;;  %vm522_vm11 = vcmp.eq.s32.totalorder %v3123_v48, %v3026_v29  ;;  %v2688_v40 = vsel %vm521_vm10, 1.0, %v2905_v11 }
 0x224   :  { %2430 = vmatpush.bf16.msrb.mxu0 %v2097_v61  ;;  %v1867_v1 = vunpack.c.l.b16 %v1257_v62  ;;  %v1868_v3 = vunpack.c.l.b16 %v1258_v43  ;;  %v2689_v4 = vsel %vm522_vm11, 1.0, %v2905_v11  ;;  %v1289_v44 = vpack.c.bf16 %v2688_v40, %v2688_v40 }
 0x225   :  { %v2048_v5 = vpack.c.b16 %v1852_v0, %v1851_v63  ;;  %v1290_v9 = vpack.c.bf16 %v2689_v4, %v2689_v4  ;;  %vm569_vm12 = vcmp.eq.s32.totalorder %v3125_v49, %v3229_v6  ;;  %vm570_vm13 = vcmp.eq.s32.totalorder %v3125_v49, %v3232_v8 }
 0x226   :  { %v2056_v17 = vpack.c.b16 %v1868_v3, %v1867_v1  ;;  %v1899_v34 = vunpack.c.l.b16 %v1289_v44  ;;  %v2736_v35 = vsel %vm569_vm12, 1.0, %v2905_v11  ;;  %v2737_v51 = vsel %vm570_vm13, 1.0, %v2905_v11 }
 0x227   :  { %2347 = vmatpush.bf16.msra.mxu2 %v2048_v5  ;;  %v1900_v53 = vunpack.c.l.b16 %v1290_v9  ;;  %v1337_v54 = vpack.c.bf16 %v2736_v35, %v2736_v35  ;;  %v1338_v55 = vpack.c.bf16 %v2737_v51, %v2737_v51  ;;  %vm471_vm3 = vcmp.eq.s32.totalorder %v3119_v45, %v3260_v38 }
 0x228   :  { %2361 = vmatpush.bf16.msra.mxu3 %v2056_v17  ;;  %vm472_vm14 = vcmp.eq.s32.totalorder %v3119_v45, %v3263_v39  ;;  %v2638_v56 = vsel %vm471_vm3, 1.0, %v2905_v11  ;;  %vm487_vm15 = vcmp.eq.s32.totalorder %v3121_v47, %v2996_v22  ;;  %vm488_vm0 = vcmp.eq.s32.totalorder %v3121_v47, %v3008_v25 }
 0x229   :  { %v2072_v57 = vpack.c.b16 %v1900_v53, %v1899_v34  ;;  %v1947_v23 = vunpack.c.l.b16 %v1337_v54  ;;  %v1948_v42 = vunpack.c.l.b16 %v1338_v55  ;;  %v2639_v58 = vsel %vm472_vm14, 1.0, %v2905_v11 }
 0x22a   :  { %v1239_v59 = vpack.c.bf16 %v2638_v56, %v2638_v56  ;;  %v1240_v60 = vpack.c.bf16 %v2639_v58, %v2639_v58  ;;  %v2654_v61 = vsel %vm487_vm15, 1.0, %v2905_v11  ;;  %v2655_v62 = vsel %vm488_vm0, 1.0, %v2905_v11 }
 0x22b   :  { %2389 = vmatpush.bf16.msrb.mxu1 %v2072_v57  ;;  %v2096_v43 = vpack.c.b16 %v1948_v42, %v1947_v23  ;;  %v1255_v63 = vpack.c.bf16 %v2654_v61, %v2654_v61  ;;  %v1256_v0 = vpack.c.bf16 %v2655_v62, %v2655_v62  ;;  %vm519_vm1 = vcmp.eq.s32.totalorder %v3123_v48, %v2996_v22 }
 0x22c   :  { %v1849_v40 = vunpack.c.l.b16 %v1239_v59  ;;  %v1850_v1 = vunpack.c.l.b16 %v1240_v60  ;;  %vm520_vm2 = vcmp.eq.s32.totalorder %v3123_v48, %v3008_v25  ;;  %v2686_v3 = vsel %vm519_vm1, 1.0, %v2905_v11 }
 0x22d   :  { %2431 = vmatpush.bf16.msrb.mxu0 %v2096_v43  ;;  %v1865_v4 = vunpack.c.l.b16 %v1255_v63  ;;  %v1866_v44 = vunpack.c.l.b16 %v1256_v0  ;;  %v2687_v5 = vsel %vm520_vm2, 1.0, %v2905_v11  ;;  %v1287_v9 = vpack.c.bf16 %v2686_v3, %v2686_v3 }
 0x22e   :  { %v2047_v17 = vpack.c.b16 %v1850_v1, %v1849_v40  ;;  %v1288_v34 = vpack.c.bf16 %v2687_v5, %v2687_v5  ;;  %vm567_vm4 = vcmp.eq.s32.totalorder %v3125_v49, %v3260_v38  ;;  %vm568_vm5 = vcmp.eq.s32.totalorder %v3125_v49, %v3263_v39 }
 0x22f   :  { %v2055_v35 = vpack.c.b16 %v1866_v44, %v1865_v4  ;;  %v1897_v51 = vunpack.c.l.b16 %v1287_v9  ;;  %v2734_v53 = vsel %vm567_vm4, 1.0, %v2905_v11  ;;  %v2735_v54 = vsel %vm568_vm5, 1.0, %v2905_v11 }
 0x230   :  { %2348 = vmatpush.bf16.msra.mxu2 %v2047_v17  ;;  %v1898_v55 = vunpack.c.l.b16 %v1288_v34  ;;  %v1335_v56 = vpack.c.bf16 %v2734_v53, %v2734_v53  ;;  %v1336_v57 = vpack.c.bf16 %v2735_v54, %v2735_v54  ;;  %vm469_vm6 = vcmp.eq.s32.totalorder %v3119_v45, %v3290_v50 }
 0x231   :  { %2362 = vmatpush.bf16.msra.mxu3 %v2055_v35  ;;  %vm470_vm7 = vcmp.eq.s32.totalorder %v3119_v45, %v3293_v52  ;;  %v2636_v23 = vsel %vm469_vm6, 1.0, %v2905_v11  ;;  %vm485_vm8 = vcmp.eq.s32.totalorder %v3121_v47, %v2969_v15  ;;  %vm486_vm9 = vcmp.eq.s32.totalorder %v3121_v47, %v2984_v19 }
 0x232   :  { %v2071_v42 = vpack.c.b16 %v1898_v55, %v1897_v51  ;;  %v1945_v58 = vunpack.c.l.b16 %v1335_v56  ;;  %v1946_v59 = vunpack.c.l.b16 %v1336_v57  ;;  %v2637_v60 = vsel %vm470_vm7, 1.0, %v2905_v11 }
 0x233   :  { %v1237_v61 = vpack.c.bf16 %v2636_v23, %v2636_v23  ;;  %v1238_v62 = vpack.c.bf16 %v2637_v60, %v2637_v60  ;;  %v2652_v43 = vsel %vm485_vm8, 1.0, %v2905_v11  ;;  %v2653_v63 = vsel %vm486_vm9, 1.0, %v2905_v11 }
 0x234   :  { %2390 = vmatpush.bf16.msrb.mxu1 %v2071_v42  ;;  %v2095_v0 = vpack.c.b16 %v1946_v59, %v1945_v58  ;;  %v1253_v40 = vpack.c.bf16 %v2652_v43, %v2652_v43  ;;  %v1254_v1 = vpack.c.bf16 %v2653_v63, %v2653_v63  ;;  %vm517_vm10 = vcmp.eq.s32.totalorder %v3123_v48, %v2969_v15 }
 0x235   :  { %v1847_v3 = vunpack.c.l.b16 %v1237_v61  ;;  %v1848_v4 = vunpack.c.l.b16 %v1238_v62  ;;  %vm518_vm11 = vcmp.eq.s32.totalorder %v3123_v48, %v2984_v19  ;;  %v2684_v44 = vsel %vm517_vm10, 1.0, %v2905_v11 }
 0x236   :  { %2432 = vmatpush.bf16.msrb.mxu0 %v2095_v0  ;;  %v1863_v5 = vunpack.c.l.b16 %v1253_v40  ;;  %v1864_v9 = vunpack.c.l.b16 %v1254_v1  ;;  %v2685_v17 = vsel %vm518_vm11, 1.0, %v2905_v11  ;;  %v1285_v34 = vpack.c.bf16 %v2684_v44, %v2684_v44 }
 0x237   :  { %v2046_v35 = vpack.c.b16 %v1848_v4, %v1847_v3  ;;  %v1286_v51 = vpack.c.bf16 %v2685_v17, %v2685_v17  ;;  %vm565_vm12 = vcmp.eq.s32.totalorder %v3125_v49, %v3290_v50  ;;  %vm566_vm13 = vcmp.eq.s32.totalorder %v3125_v49, %v3293_v52 }
 0x238   :  { %v2054_v53 = vpack.c.b16 %v1864_v9, %v1863_v5  ;;  %v1895_v54 = vunpack.c.l.b16 %v1285_v34  ;;  %v2732_v55 = vsel %vm565_vm12, 1.0, %v2905_v11  ;;  %v2733_v56 = vsel %vm566_vm13, 1.0, %v2905_v11 }
 0x239   :  { %2349 = vmatpush.bf16.msra.mxu2 %v2046_v35  ;;  %v1896_v57 = vunpack.c.l.b16 %v1286_v51  ;;  %v1333_v23 = vpack.c.bf16 %v2732_v55, %v2732_v55  ;;  %v1334_v42 = vpack.c.bf16 %v2733_v56, %v2733_v56  ;;  %vm467_vm3 = vcmp.eq.s32.totalorder %v3119_v45, %v3318_v36 }
 0x23a   :  { %2363 = vmatpush.bf16.msra.mxu3 %v2054_v53  ;;  %vm468_vm14 = vcmp.eq.s32.totalorder %v3119_v45, %v3321_v37  ;;  %v2634_v58 = vsel %vm467_vm3, 1.0, %v2905_v11  ;;  %vm483_vm15 = vcmp.eq.s32.totalorder %v3121_v47, %v2934_v2  ;;  %vm484_vm0 = vcmp.eq.s32.totalorder %v3121_v47, %v2943_v7 }
 0x23b   :  { %v2070_v59 = vpack.c.b16 %v1896_v57, %v1895_v54  ;;  %v1943_v60 = vunpack.c.l.b16 %v1333_v23  ;;  %v1944_v61 = vunpack.c.l.b16 %v1334_v42  ;;  %v2635_v62 = vsel %vm468_vm14, 1.0, %v2905_v11 }
 0x23c   :  { %v1235_v43 = vpack.c.bf16 %v2634_v58, %v2634_v58  ;;  %v1236_v63 = vpack.c.bf16 %v2635_v62, %v2635_v62  ;;  %v2650_v0 = vsel %vm483_vm15, 1.0, %v2905_v11  ;;  %v2651_v40 = vsel %vm484_vm0, 1.0, %v2905_v11 }
 0x23d   :  { %2391 = vmatpush.bf16.msrb.mxu1 %v2070_v59  ;;  %v2094_v45 = vpack.c.b16 %v1944_v61, %v1943_v60  ;;  %v1251_v1 = vpack.c.bf16 %v2650_v0, %v2650_v0  ;;  %v1252_v3 = vpack.c.bf16 %v2651_v40, %v2651_v40  ;;  %vm545_vm1 = vcmp.eq.s32.totalorder %v3123_v48, %v3062_v13  ;;  %v2849_v59 = vld [vmem:[#allocation3 + $0x1c] sm:$0xf] }
 0x23e   :  { %v1845_v4 = vunpack.c.l.b16 %v1235_v43  ;;  %v1846_v47 = vunpack.c.l.b16 %v1236_v63  ;;  %vm546_vm2 = vcmp.eq.s32.totalorder %v3123_v48, %v3065_v14  ;;  %v2712_v44 = vsel %vm545_vm1, 1.0, %v2905_v11  ;;  %v2806_v60 = vld [vmem:[#allocation3 + $0x58] sm:$0x10] }
 0x23f   :  { %2433 = vmatpush.bf16.msrb.mxu0 %v2094_v45  ;;  %v1861_v5 = vunpack.c.l.b16 %v1251_v1  ;;  %v1862_v9 = vunpack.c.l.b16 %v1252_v3  ;;  %v2713_v17 = vsel %vm546_vm2, 1.0, %v2905_v11  ;;  %v1313_v34 = vpack.c.bf16 %v2712_v44, %v2712_v44 }
 0x240   :  { %v2045_v35 = vpack.c.b16 %v1846_v47, %v1845_v4  ;;  %v1314_v51 = vpack.c.bf16 %v2713_v17, %v2713_v17  ;;  %vm561_vm4 = vcmp.eq.s32.totalorder %v3125_v49, %v3056_v10  ;;  %vm562_vm5 = vcmp.eq.s32.totalorder %v3125_v49, %v3059_v12 }
 0x241   :  { %v2053_v53 = vpack.c.b16 %v1862_v9, %v1861_v5  ;;  %v1923_v54 = vunpack.c.l.b16 %v1313_v34  ;;  %v2728_v55 = vsel %vm561_vm4, 1.0, %v2905_v11  ;;  %v2729_v56 = vsel %vm562_vm5, 1.0, %v2905_v11  ;;  %v2812_v5 = vld [vmem:[#allocation3 + $0x20] sm:$0xf] }
 0x242   :  { %2350 = vmatpush.bf16.msra.mxu2 %v2045_v35  ;;  %v1924_v57 = vunpack.c.l.b16 %v1314_v51  ;;  %v1329_v23 = vpack.c.bf16 %v2728_v55, %v2728_v55  ;;  %v1330_v42 = vpack.c.bf16 %v2729_v56, %v2729_v56  ;;  %vm515_vm6 = vcmp.eq.s32.totalorder %v3123_v48, %v2934_v2  ;;  %v2858_v9 = vld [vmem:[#allocation3 + $0x5c] sm:$0x10] }
 0x243   :  { %2364 = vmatpush.bf16.msra.mxu3 %v2053_v53  ;;  %vm516_vm7 = vcmp.eq.s32.totalorder %v3123_v48, %v2943_v7  ;;  %v2682_v58 = vsel %vm515_vm6, 1.0, %v2905_v11  ;;  %vm563_vm8 = vcmp.eq.s32.totalorder %v3125_v49, %v3318_v36  ;;  %vm564_vm9 = vcmp.eq.s32.totalorder %v3125_v49, %v3321_v37 }
 0x244   :  { %v2084_v61 = vpack.c.b16 %v1924_v57, %v1923_v54  ;;  %v1939_v62 = vunpack.c.l.b16 %v1329_v23  ;;  %v1940_v43 = vunpack.c.l.b16 %v1330_v42  ;;  %v2683_v63 = vsel %vm516_vm7, 1.0, %v2905_v11 }
 0x245   :  { %v1283_v0 = vpack.c.bf16 %v2682_v58, %v2682_v58  ;;  %v1284_v40 = vpack.c.bf16 %v2683_v63, %v2683_v63  ;;  %v2730_v45 = vsel %vm563_vm8, 1.0, %v2905_v11  ;;  %v2731_v1 = vsel %vm564_vm9, 1.0, %v2905_v11 }
 0x246   :  { %2399 = vmatpush.bf16.msrb.mxu2 %v2084_v61  ;;  %v2092_v3 = vpack.c.b16 %v1940_v43, %v1939_v62  ;;  %v1331_v4 = vpack.c.bf16 %v2730_v45, %v2730_v45  ;;  %v1332_v47 = vpack.c.bf16 %v2731_v1, %v2731_v1  ;;  %v2809_v44 = vor.u32 %v2849_v59, %v2806_v60 }
 0x247   :  { %v1893_v17 = vunpack.c.l.b16 %v1283_v0  ;;  %v1894_v34 = vunpack.c.l.b16 %v1284_v40  ;;  %vm593_vm10 = vcmp.eq.s32.totalorder %v3549_v46, %v3056_v10  ;;  %vm594_vm11 = vcmp.eq.s32.totalorder %v3549_v46, %v3059_v12 }
 0x248   :  { %2413 = vmatpush.bf16.msrb.mxu3 %v2092_v3  ;;  %v1941_v35 = vunpack.c.l.b16 %v1331_v4  ;;  %v1942_v51 = vunpack.c.l.b16 %v1332_v47  ;;  %2351 = vmatmul.bf16.vlgmr.msra.gmra.mxu2 %v2809_v44  ;;  %v2760_v53 = vsel %vm593_vm10, 1.0, %v2905_v11  ;;  %v2761_v54 = vsel %vm594_vm11, 1.0, %v2905_v11 }
 0x249   :  { %v2069_v55 = vpack.c.b16 %v1894_v34, %v1893_v17  ;;  %v1361_v56 = vpack.c.bf16 %v2760_v53, %v2760_v53  ;;  %v1362_v57 = vpack.c.bf16 %v2761_v54, %v2761_v54  ;;  %v2813_v23 = vor.u32 %v2858_v9, %v2812_v5 }
 0x24a   :  { %v2093_v42 = vpack.c.b16 %v1942_v51, %v1941_v35  ;;  %vm543_vm12 = vcmp.eq.s32.totalorder %v3123_v48, %v3074_v20  ;;  %vm544_vm13 = vcmp.eq.s32.totalorder %v3123_v48, %v3077_v21  ;;  %vm559_vm3 = vcmp.eq.s32.totalorder %v3125_v49, %v3068_v16 }
 0x24b   :  { %2392 = vmatpush.bf16.msrb.mxu1 %v2069_v55  ;;  %v1971_v10 = vunpack.c.l.b16 %v1361_v56  ;;  %v1972_v12 = vunpack.c.l.b16 %v1362_v57  ;;  %2365 = vmatmul.bf16.vlgmr.msra.gmra.mxu3 %v2813_v23  ;;  %v2710_v58 = vsel %vm543_vm12, 1.0, %v2905_v11  ;;  %v2711_v59 = vsel %vm544_vm13, 1.0, %v2905_v11 }
 0x24c   :  { %2434 = vmatpush.bf16.msrb.mxu0 %v2093_v42  ;;  %v1311_v60 = vpack.c.bf16 %v2710_v58, %v2710_v58  ;;  %v1312_v61 = vpack.c.bf16 %v2711_v59, %v2711_v59  ;;  %vm560_vm14 = vcmp.eq.s32.totalorder %v3125_v49, %v3071_v18  ;;  %v2726_v62 = vsel %vm559_vm3, 1.0, %v2905_v11 }
 0x24d   :  { %v2108_v43 = vpack.c.b16 %v1972_v12, %v1971_v10  ;;  %v2727_v63 = vsel %vm560_vm14, 1.0, %v2905_v11  ;;  %v1327_v0 = vpack.c.bf16 %v2726_v62, %v2726_v62  ;;  %vm591_vm15 = vcmp.eq.s32.totalorder %v3549_v46, %v3068_v16  ;;  %v2850_v10 = vld [vmem:[#allocation3 + $0x24] sm:$0xf] }
 0x24e   :  { %v1921_v40 = vunpack.c.l.b16 %v1311_v60  ;;  %v1922_v45 = vunpack.c.l.b16 %v1312_v61  ;;  %v1328_v1 = vpack.c.bf16 %v2727_v63, %v2727_v63  ;;  %vm592_vm0 = vcmp.eq.s32.totalorder %v3549_v46, %v3071_v18  ;;  %v2814_v12 = vld [vmem:[#allocation3 + $0x60] sm:$0x10] }
 0x24f   :  { %2441 = vmatpush.bf16.msra.mxu1 %v2108_v43  ;;  %v1937_v3 = vunpack.c.l.b16 %v1327_v0  ;;  %v2758_v4 = vsel %vm591_vm15, 1.0, %v2905_v11  ;;  %v2759_v47 = vsel %vm592_vm0, 1.0, %v2905_v11  ;;  %vm541_vm1 = vcmp.eq.s32.totalorder %v3123_v48, %v3088_v28 }
 0x250   :  { %v2083_v44 = vpack.c.b16 %v1922_v45, %v1921_v40  ;;  %v1938_v5 = vunpack.c.l.b16 %v1328_v1  ;;  %v1359_v9 = vpack.c.bf16 %v2758_v4, %v2758_v4  ;;  %v1360_v17 = vpack.c.bf16 %v2759_v47, %v2759_v47  ;;  %v2859_v1 = vld [vmem:[#allocation3 + $0x64] sm:$0x10] }
 0x251   :  { %vm542_vm2 = vcmp.eq.s32.totalorder %v3123_v48, %v3091_v30  ;;  %v2708_v16 = vsel %vm541_vm1, 1.0, %v2905_v11  ;;  %vm557_vm4 = vcmp.eq.s32.totalorder %v3125_v49, %v3082_v24  ;;  %vm558_vm5 = vcmp.eq.s32.totalorder %v3125_v49, %v3085_v26 }
 0x252   :  { %2400 = vmatpush.bf16.msrb.mxu2 %v2083_v44  ;;  %v2091_v18 = vpack.c.b16 %v1938_v5, %v1937_v3  ;;  %v1969_v34 = vunpack.c.l.b16 %v1359_v9  ;;  %v1970_v35 = vunpack.c.l.b16 %v1360_v17  ;;  %v2709_v51 = vsel %vm542_vm2, 1.0, %v2905_v11 }
 0x253   :  { %v1309_v53 = vpack.c.bf16 %v2708_v16, %v2708_v16  ;;  %v1310_v54 = vpack.c.bf16 %v2709_v51, %v2709_v51  ;;  %v2724_v55 = vsel %vm557_vm4, 1.0, %v2905_v11  ;;  %v2725_v56 = vsel %vm558_vm5, 1.0, %v2905_v11 }
 0x254   :  { %2414 = vmatpush.bf16.msrb.mxu3 %v2091_v18  ;;  %v2107_v57 = vpack.c.b16 %v1970_v35, %v1969_v34  ;;  %v1325_v23 = vpack.c.bf16 %v2724_v55, %v2724_v55  ;;  %v1326_v42 = vpack.c.bf16 %v2725_v56, %v2725_v56  ;;  %vm589_vm6 = vcmp.eq.s32.totalorder %v3549_v46, %v3082_v24  ;;  %v2820_v24 = vld [vmem:[#allocation3 + $0x28] sm:$0xf] }
 0x255   :  { %v1919_v58 = vunpack.c.l.b16 %v1309_v53  ;;  %v1920_v59 = vunpack.c.l.b16 %v1310_v54  ;;  %vm590_vm7 = vcmp.eq.s32.totalorder %v3549_v46, %v3085_v26  ;;  %v2756_v60 = vsel %vm589_vm6, 1.0, %v2905_v11 }
 0x256   :  { %2442 = vmatpush.bf16.msra.mxu1 %v2107_v57  ;;  %v1935_v61 = vunpack.c.l.b16 %v1325_v23  ;;  %v1936_v62 = vunpack.c.l.b16 %v1326_v42  ;;  %v2757_v43 = vsel %vm590_vm7, 1.0, %v2905_v11  ;;  %v1357_v63 = vpack.c.bf16 %v2756_v60, %v2756_v60 }
 0x257   :  { %v2082_v0 = vpack.c.b16 %v1920_v59, %v1919_v58  ;;  %v1358_v40 = vpack.c.bf16 %v2757_v43, %v2757_v43  ;;  %v2817_v45 = vor.u32 %v2850_v10, %v2814_v12  ;;  %vm539_vm8 = vcmp.eq.s32.totalorder %v3123_v48, %v3100_v33 }
 0x258   :  { %v2090_v3 = vpack.c.b16 %v1936_v62, %v1935_v61  ;;  %v1967_v4 = vunpack.c.l.b16 %v1357_v63  ;;  %vm540_vm9 = vcmp.eq.s32.totalorder %v3123_v48, %v3112_v41  ;;  %v2706_v26 = vsel %vm539_vm8, 1.0, %v2905_v11 }
 0x259   :  { %2401 = vmatpush.bf16.msrb.mxu2 %v2082_v0  ;;  %v1968_v47 = vunpack.c.l.b16 %v1358_v40  ;;  %2379 = vmatmul.bf16.vlgmr.msra.gmra.mxu0 %v2817_v45  ;;  %v2707_v44 = vsel %vm540_vm9, 1.0, %v2905_v11  ;;  %v1307_v5 = vpack.c.bf16 %v2706_v26, %v2706_v26  ;;  %vm555_vm10 = vcmp.eq.s32.totalorder %v3125_v49, %v3094_v31 }
 0x25a   :  { %2415 = vmatpush.bf16.msrb.mxu3 %v2090_v3  ;;  %v1308_v9 = vpack.c.bf16 %v2707_v44, %v2707_v44  ;;  %vm556_vm11 = vcmp.eq.s32.totalorder %v3125_v49, %v3097_v32  ;;  %v2722_v17 = vsel %vm555_vm10, 1.0, %v2905_v11  ;;  %v2821_v16 = vor.u32 %v2859_v1, %v2820_v24 }
 0x25b   :  { %v2106_v18 = vpack.c.b16 %v1968_v47, %v1967_v4  ;;  %v1917_v34 = vunpack.c.l.b16 %v1307_v5  ;;  %v2723_v35 = vsel %vm556_vm11, 1.0, %v2905_v11  ;;  %v1323_v51 = vpack.c.bf16 %v2722_v17, %v2722_v17 }
 0x25c   :  { %v1918_v53 = vunpack.c.l.b16 %v1308_v9  ;;  %v1324_v54 = vpack.c.bf16 %v2723_v35, %v2723_v35  ;;  %2393 = vmatmul.bf16.vlgmr.msrb.gmra.mxu1 %v2821_v16  ;;  %vm587_vm12 = vcmp.eq.s32.totalorder %v3549_v46, %v3094_v31  ;;  %vm588_vm13 = vcmp.eq.s32.totalorder %v3549_v46, %v3097_v32 }
 0x25d   :  { %2443 = vmatpush.bf16.msra.mxu1 %v2106_v18  ;;  %v1933_v55 = vunpack.c.l.b16 %v1323_v51  ;;  %v2754_v56 = vsel %vm587_vm12, 1.0, %v2905_v11  ;;  %v2755_v57 = vsel %vm588_vm13, 1.0, %v2905_v11  ;;  %vm537_vm3 = vcmp.eq.s32.totalorder %v3123_v48, %v3229_v6 }
 0x25e   :  { %v2081_v23 = vpack.c.b16 %v1918_v53, %v1917_v34  ;;  %v1934_v42 = vunpack.c.l.b16 %v1324_v54  ;;  %v1355_v10 = vpack.c.bf16 %v2754_v56, %v2754_v56  ;;  %v1356_v12 = vpack.c.bf16 %v2755_v57, %v2755_v57 }
 0x25f   :  { %vm538_vm14 = vcmp.eq.s32.totalorder %v3123_v48, %v3232_v8  ;;  %v2704_v31 = vsel %vm537_vm3, 1.0, %v2905_v11  ;;  %vm553_vm15 = vcmp.eq.s32.totalorder %v3125_v49, %v3017_v27  ;;  %vm554_vm0 = vcmp.eq.s32.totalorder %v3125_v49, %v3026_v29 }
 0x260   :  { %2402 = vmatpush.bf16.msrb.mxu2 %v2081_v23  ;;  %v2089_v32 = vpack.c.b16 %v1934_v42, %v1933_v55  ;;  %v1965_v58 = vunpack.c.l.b16 %v1355_v10  ;;  %v1966_v59 = vunpack.c.l.b16 %v1356_v12  ;;  %v2705_v60 = vsel %vm538_vm14, 1.0, %v2905_v11 }
 0x261   :  { %v1305_v61 = vpack.c.bf16 %v2704_v31, %v2704_v31  ;;  %v1306_v62 = vpack.c.bf16 %v2705_v60, %v2705_v60  ;;  %v2720_v43 = vsel %vm553_vm15, 1.0, %v2905_v11  ;;  %v2721_v63 = vsel %vm554_vm0, 1.0, %v2905_v11 }
 0x262   :  { %2416 = vmatpush.bf16.msrb.mxu3 %v2089_v32  ;;  %v2105_v0 = vpack.c.b16 %v1966_v59, %v1965_v58  ;;  %v1321_v40 = vpack.c.bf16 %v2720_v43, %v2720_v43  ;;  %v1322_v45 = vpack.c.bf16 %v2721_v63, %v2721_v63  ;;  %vm585_vm1 = vcmp.eq.s32.totalorder %v3549_v46, %v3017_v27 }
 0x263   :  { %v1915_v24 = vunpack.c.l.b16 %v1305_v61  ;;  %v1916_v1 = vunpack.c.l.b16 %v1306_v62  ;;  %vm586_vm2 = vcmp.eq.s32.totalorder %v3549_v46, %v3026_v29  ;;  %v2752_v3 = vsel %vm585_vm1, 1.0, %v2905_v11 }
 0x264   :  { %2444 = vmatpush.bf16.msra.mxu1 %v2105_v0  ;;  %v1931_v4 = vunpack.c.l.b16 %v1321_v40  ;;  %v1932_v26 = vunpack.c.l.b16 %v1322_v45  ;;  %v2753_v47 = vsel %vm586_vm2, 1.0, %v2905_v11  ;;  %v1353_v44 = vpack.c.bf16 %v2752_v3, %v2752_v3 }
 0x265   :  { %v2080_v5 = vpack.c.b16 %v1916_v1, %v1915_v24  ;;  %v1354_v9 = vpack.c.bf16 %v2753_v47, %v2753_v47  ;;  %vm535_vm4 = vcmp.eq.s32.totalorder %v3123_v48, %v3260_v38  ;;  %vm536_vm5 = vcmp.eq.s32.totalorder %v3123_v48, %v3263_v39 }
 0x266   :  { %v2088_v27 = vpack.c.b16 %v1932_v26, %v1931_v4  ;;  %v1963_v17 = vunpack.c.l.b16 %v1353_v44  ;;  %v2702_v29 = vsel %vm535_vm4, 1.0, %v2905_v11  ;;  %v2703_v16 = vsel %vm536_vm5, 1.0, %v2905_v11 }
 0x267   :  { %2403 = vmatpush.bf16.msrb.mxu2 %v2080_v5  ;;  %v1964_v18 = vunpack.c.l.b16 %v1354_v9  ;;  %v1303_v34 = vpack.c.bf16 %v2702_v29, %v2702_v29  ;;  %v1304_v35 = vpack.c.bf16 %v2703_v16, %v2703_v16  ;;  %vm551_vm6 = vcmp.eq.s32.totalorder %v3125_v49, %v2996_v22 }
 0x268   :  { %2417 = vmatpush.bf16.msrb.mxu3 %v2088_v27  ;;  %vm552_vm7 = vcmp.eq.s32.totalorder %v3125_v49, %v3008_v25  ;;  %v2718_v51 = vsel %vm551_vm6, 1.0, %v2905_v11  ;;  %vm583_vm8 = vcmp.eq.s32.totalorder %v3549_v46, %v2996_v22  ;;  %vm584_vm9 = vcmp.eq.s32.totalorder %v3549_v46, %v3008_v25 }
 0x269   :  { %v2104_v53 = vpack.c.b16 %v1964_v18, %v1963_v17  ;;  %v1913_v54 = vunpack.c.l.b16 %v1303_v34  ;;  %v1914_v55 = vunpack.c.l.b16 %v1304_v35  ;;  %v2719_v56 = vsel %vm552_vm7, 1.0, %v2905_v11 }
 0x26a   :  { %v1319_v57 = vpack.c.bf16 %v2718_v51, %v2718_v51  ;;  %v1320_v23 = vpack.c.bf16 %v2719_v56, %v2719_v56  ;;  %v2750_v42 = vsel %vm583_vm8, 1.0, %v2905_v11  ;;  %v2751_v10 = vsel %vm584_vm9, 1.0, %v2905_v11  ;;  %v2851_v56 = vld [vmem:[#allocation3 + $0x2c] sm:$0xf] }
 0x26b   :  { %2445 = vmatpush.bf16.msra.mxu1 %v2104_v53  ;;  %v2079_v12 = vpack.c.b16 %v1914_v55, %v1913_v54  ;;  %v1351_v31 = vpack.c.bf16 %v2750_v42, %v2750_v42  ;;  %v1352_v32 = vpack.c.bf16 %v2751_v10, %v2751_v10  ;;  %vm533_vm10 = vcmp.eq.s32.totalorder %v3123_v48, %v3290_v50  ;;  %v2822_v42 = vld [vmem:[#allocation3 + $0x68] sm:$0x10]  ;;  %v2828_v10 = vld [vmem:[#allocation3 + $0x30] sm:$0xf] }
 0x26c   :  { %v1929_v22 = vunpack.c.l.b16 %v1319_v57  ;;  %v1930_v25 = vunpack.c.l.b16 %v1320_v23  ;;  %vm534_vm11 = vcmp.eq.s32.totalorder %v3123_v48, %v3293_v52  ;;  %v2700_v58 = vsel %vm533_vm10, 1.0, %v2905_v11 }
 0x26d   :  { %2404 = vmatpush.bf16.msrb.mxu2 %v2079_v12  ;;  %v1961_v59 = vunpack.c.l.b16 %v1351_v31  ;;  %v1962_v60 = vunpack.c.l.b16 %v1352_v32  ;;  %v2701_v61 = vsel %vm534_vm11, 1.0, %v2905_v11  ;;  %v1301_v62 = vpack.c.bf16 %v2700_v58, %v2700_v58 }
 0x26e   :  { %v2087_v43 = vpack.c.b16 %v1930_v25, %v1929_v22  ;;  %v1302_v63 = vpack.c.bf16 %v2701_v61, %v2701_v61  ;;  %vm549_vm12 = vcmp.eq.s32.totalorder %v3125_v49, %v2969_v15  ;;  %vm550_vm13 = vcmp.eq.s32.totalorder %v3125_v49, %v2984_v19 }
 0x26f   :  { %v2103_v0 = vpack.c.b16 %v1962_v60, %v1961_v59  ;;  %v1911_v40 = vunpack.c.l.b16 %v1301_v62  ;;  %v2716_v45 = vsel %vm549_vm12, 1.0, %v2905_v11  ;;  %v2717_v24 = vsel %vm550_vm13, 1.0, %v2905_v11 }
 0x270   :  { %2418 = vmatpush.bf16.msrb.mxu3 %v2087_v43  ;;  %v1912_v1 = vunpack.c.l.b16 %v1302_v63  ;;  %v1317_v3 = vpack.c.bf16 %v2716_v45, %v2716_v45  ;;  %v1318_v4 = vpack.c.bf16 %v2717_v24, %v2717_v24  ;;  %vm581_vm3 = vcmp.eq.s32.totalorder %v3549_v46, %v2969_v15  ;;  %v2830_v45 = vld [vmem:[#allocation3 + $0x70] sm:$0x10] }
 0x271   :  { %2446 = vmatpush.bf16.msra.mxu1 %v2103_v0  ;;  %vm582_vm14 = vcmp.eq.s32.totalorder %v3549_v46, %v2984_v19  ;;  %v2748_v26 = vsel %vm581_vm3, 1.0, %v2905_v11  ;;  %vm531_vm15 = vcmp.eq.s32.totalorder %v3123_v48, %v3318_v36  ;;  %vm532_vm0 = vcmp.eq.s32.totalorder %v3123_v48, %v3321_v37 }
 0x272   :  { %v2078_v47 = vpack.c.b16 %v1912_v1, %v1911_v40  ;;  %v1927_v44 = vunpack.c.l.b16 %v1317_v3  ;;  %v1928_v5 = vunpack.c.l.b16 %v1318_v4  ;;  %v2749_v9 = vsel %vm582_vm14, 1.0, %v2905_v11 }
 0x273   :  { %v1349_v27 = vpack.c.bf16 %v2748_v26, %v2748_v26  ;;  %v1350_v17 = vpack.c.bf16 %v2749_v9, %v2749_v9  ;;  %v2698_v15 = vsel %vm531_vm15, 1.0, %v2905_v11  ;;  %v2699_v29 = vsel %vm532_vm0, 1.0, %v2905_v11 }
 0x274   :  { %2405 = vmatpush.bf16.msrb.mxu2 %v2078_v47  ;;  %v2086_v19 = vpack.c.b16 %v1928_v5, %v1927_v44  ;;  %v1299_v16 = vpack.c.bf16 %v2698_v15, %v2698_v15  ;;  %v1300_v18 = vpack.c.bf16 %v2699_v29, %v2699_v29  ;;  %vm547_vm1 = vcmp.eq.s32.totalorder %v3125_v49, %v2934_v2  ;;  %v2836_v44 = vld [vmem:[#allocation3 + $0x38] sm:$0xf] }
 0x275   :  { %v1959_v34 = vunpack.c.l.b16 %v1349_v27  ;;  %v1960_v48 = vunpack.c.l.b16 %v1350_v17  ;;  %vm548_vm2 = vcmp.eq.s32.totalorder %v3125_v49, %v2943_v7  ;;  %v2714_v35 = vsel %vm547_vm1, 1.0, %v2905_v11  ;;  %v2860_v49 = vld [vmem:[#allocation3 + $0x6c] sm:$0x10]  ;;  %v2861_v5 = vld [vmem:[#allocation3 + $0x74] sm:$0x10] }
 0x276   :  { %2419 = vmatpush.bf16.msrb.mxu3 %v2086_v19  ;;  %v1909_v51 = vunpack.c.l.b16 %v1299_v16  ;;  %v1910_v53 = vunpack.c.l.b16 %v1300_v18  ;;  %v2715_v54 = vsel %vm548_vm2, 1.0, %v2905_v11  ;;  %v1315_v55 = vpack.c.bf16 %v2714_v35, %v2714_v35 }
 0x277   :  { %v2102_v57 = vpack.c.b16 %v1960_v48, %v1959_v34  ;;  %v1316_v23 = vpack.c.bf16 %v2715_v54, %v2715_v54  ;;  %vm609_vm4 = vcmp.eq.s32.totalorder %v3549_v46, %v3062_v13  ;;  %vm610_vm5 = vcmp.eq.s32.totalorder %v3549_v46, %v3065_v14 }
 0x278   :  { %v2077_v12 = vpack.c.b16 %v1910_v53, %v1909_v51  ;;  %v1925_v31 = vunpack.c.l.b16 %v1315_v55  ;;  %v2776_v32 = vsel %vm609_vm4, 1.0, %v2905_v11  ;;  %v2777_v22 = vsel %vm610_vm5, 1.0, %v2905_v11 }
 0x279   :  { %2447 = vmatpush.bf16.msra.mxu1 %v2102_v57  ;;  %v1926_v25 = vunpack.c.l.b16 %v1316_v23  ;;  %v1377_v58 = vpack.c.bf16 %v2776_v32, %v2776_v32  ;;  %v1378_v59 = vpack.c.bf16 %v2777_v22, %v2777_v22  ;;  %vm579_vm6 = vcmp.eq.s32.totalorder %v3549_v46, %v2934_v2  ;;  %v2852_v2 = vld [vmem:[#allocation3 + $0x34] sm:$0xf] }
 0x27a   :  { %2406 = vmatpush.bf16.msrb.mxu2 %v2077_v12  ;;  %vm580_vm7 = vcmp.eq.s32.totalorder %v3549_v46, %v2943_v7  ;;  %v2746_v13 = vsel %vm579_vm6, 1.0, %v2905_v11  ;;  %v2825_v14 = vor.u32 %v2851_v56, %v2822_v42  ;;  %v2829_v60 = vor.u32 %v2860_v49, %v2828_v10 }
 0x27b   :  { %v2085_v61 = vpack.c.b16 %v1926_v25, %v1925_v31  ;;  %v1987_v62 = vunpack.c.l.b16 %v1377_v58  ;;  %v1988_v43 = vunpack.c.l.b16 %v1378_v59  ;;  %v2747_v63 = vsel %vm580_vm7, 1.0, %v2905_v11 }
 0x27c   :  { %v1347_v0 = vpack.c.bf16 %v2746_v13, %v2746_v13  ;;  %v1348_v40 = vpack.c.bf16 %v2747_v63, %v2747_v63  ;;  %vm607_vm8 = vcmp.eq.s32.totalorder %v3549_v46, %v3074_v20  ;;  %vm608_vm9 = vcmp.eq.s32.totalorder %v3549_v46, %v3077_v21 }
 0x27d   :  { %2420 = vmatpush.bf16.msrb.mxu3 %v2085_v61  ;;  %v2116_v7 = vpack.c.b16 %v1988_v43, %v1987_v62  ;;  %2407 = vmatmul.bf16.vlgmr.msrb.gmra.mxu2 %v2825_v14  ;;  %v2774_v24 = vsel %vm607_vm8, 1.0, %v2905_v11  ;;  %v2775_v1 = vsel %vm608_vm9, 1.0, %v2905_v11  ;;  %vm605_vm10 = vcmp.eq.s32.totalorder %v3549_v46, %v3088_v28 }
 0x27e   :  { %v1957_v3 = vunpack.c.l.b16 %v1347_v0  ;;  %v1958_v4 = vunpack.c.l.b16 %v1348_v40  ;;  %v1375_v26 = vpack.c.bf16 %v2774_v24, %v2774_v24  ;;  %v1376_v47 = vpack.c.bf16 %v2775_v1, %v2775_v1  ;;  %v2254_v40 = vpop.f32.mrf.mxu2 }
 0x27f   :  { %2455 = vmatpush.bf16.msra.mxu2 %v2116_v7  ;;  %vm606_vm11 = vcmp.eq.s32.totalorder %v3549_v46, %v3091_v30  ;;  %v2772_v20 = vsel %vm605_vm10, 1.0, %v2905_v11  ;;  %v2833_v21 = vor.u32 %v2852_v2, %v2830_v45  ;;  %vm603_vm12 = vcmp.eq.s32.totalorder %v3549_v46, %v3100_v33  ;;  %v2268_v2 = vpop.f32.mrf.mxu3  ;;  %v2282_v7 = vpop.f32.mrf.mxu1 }
 0x280   :  { %v2101_v9 = vpack.c.b16 %v1958_v4, %v1957_v3  ;;  %2421 = vmatmul.bf16.vlgmr.msrb.gmra.mxu3 %v2829_v60  ;;  %v1985_v27 = vunpack.c.l.b16 %v1375_v26  ;;  %v1986_v28 = vunpack.c.l.b16 %v1376_v47  ;;  %v2773_v17 = vsel %vm606_vm11, 1.0, %v2905_v11  ;;  %v2324_v47 = vpop.f32.mrf.mxu0 }
 0x281   :  { %v1373_v15 = vpack.c.bf16 %v2772_v20, %v2772_v20  ;;  %v1374_v29 = vpack.c.bf16 %v2773_v17, %v2773_v17  ;;  %2435 = vmatmul.bf16.vlgmr.msrb.gmra.mxu0 %v2833_v21  ;;  %vm604_vm13 = vcmp.eq.s32.totalorder %v3549_v46, %v3112_v41  ;;  %v2770_v30 = vsel %vm603_vm12, 1.0, %v2905_v11 }
 0x282   :  { %2448 = vmatpush.bf16.msra.mxu1 %v2101_v9  ;;  %v2115_v19 = vpack.c.b16 %v1986_v28, %v1985_v27  ;;  %v2771_v33 = vsel %vm604_vm13, 1.0, %v2905_v11  ;;  %v1371_v16 = vpack.c.bf16 %v2770_v30, %v2770_v30  ;;  %v2837_v18 = vor.u32 %v2861_v5, %v2836_v44 }
 0x283   :  { %v1983_v34 = vunpack.c.l.b16 %v1373_v15  ;;  %v1984_v48 = vunpack.c.l.b16 %v1374_v29  ;;  %v1372_v35 = vpack.c.bf16 %v2771_v33, %v2771_v33  ;;  %vm601_vm3 = vcmp.eq.s32.totalorder %v3549_v46, %v3229_v6 }
 0x284   :  { %2456 = vmatpush.bf16.msra.mxu2 %v2115_v19  ;;  %vm602_vm14 = vcmp.eq.s32.totalorder %v3549_v46, %v3232_v8  ;;  %v2768_v41 = vsel %vm601_vm3, 1.0, %v2905_v11  ;;  %vm599_vm15 = vcmp.eq.s32.totalorder %v3549_v46, %v3260_v38  ;;  %v1981_v51 = vunpack.c.l.b16 %v1371_v16 }
 0x285   :  { %v1982_v53 = vunpack.c.l.b16 %v1372_v35  ;;  %2449 = vmatmul.bf16.vlgmr.msra.gmra.mxu1 %v2837_v18  ;;  %v2769_v54 = vsel %vm602_vm14, 1.0, %v2905_v11  ;;  %v1369_v55 = vpack.c.bf16 %v2768_v41, %v2768_v41  ;;  %v2114_v56 = vpack.c.b16 %v1984_v48, %v1983_v34 }
 0x286   :  { %v1370_v57 = vpack.c.bf16 %v2769_v54, %v2769_v54  ;;  %vm600_vm0 = vcmp.eq.s32.totalorder %v3549_v46, %v3263_v39  ;;  %v2766_v6 = vsel %vm599_vm15, 1.0, %v2905_v11  ;;  %vm597_vm1 = vcmp.eq.s32.totalorder %v3549_v46, %v3290_v50  ;;  %v2256_v45 = vpop.f32.mrf.mxu2 }
 0x287   :  { %v2767_v8 = vsel %vm600_vm0, 1.0, %v2905_v11  ;;  %vm598_vm2 = vcmp.eq.s32.totalorder %v3549_v46, %v3293_v52  ;;  %v2113_v38 = vpack.c.b16 %v1982_v53, %v1981_v51  ;;  %v1979_v23 = vunpack.c.l.b16 %v1369_v55  ;;  %v2270_v24 = vpop.f32.mrf.mxu3  ;;  %v2284_v3 = vpop.f32.mrf.mxu1 }
 0x288   :  { %2457 = vmatpush.bf16.msra.mxu2 %v2114_v56  ;;  %v1980_v42 = vunpack.c.l.b16 %v1370_v57  ;;  %v1367_v10 = vpack.c.bf16 %v2766_v6, %v2766_v6  ;;  %v1368_v49 = vpack.c.bf16 %v2767_v8, %v2767_v8  ;;  %v2764_v12 = vsel %vm597_vm1, 1.0, %v2905_v11  ;;  %v2326_v17 = vpop.f32.mrf.mxu0 }
 0x289   :  { %v2765_v39 = vsel %vm598_vm2, 1.0, %v2905_v11  ;;  %vm595_vm4 = vcmp.eq.s32.totalorder %v3549_v46, %v3318_v36  ;;  %vm596_vm5 = vcmp.eq.s32.totalorder %v3549_v46, %v3321_v37  ;;  %v1365_v50 = vpack.c.bf16 %v2764_v12, %v2764_v12  ;;  %v2853_v37 = vld [vmem:[#allocation3 + $0x3c] sm:$0xf] }
 0x28a   :  { %v2112_v31 = vpack.c.b16 %v1980_v42, %v1979_v23  ;;  %v1977_v32 = vunpack.c.l.b16 %v1367_v10  ;;  %v1978_v52 = vunpack.c.l.b16 %v1368_v49  ;;  %v1366_v22 = vpack.c.bf16 %v2765_v39, %v2765_v39  ;;  %v2838_v46 = vld [vmem:[#allocation3 + $0x78] sm:$0x10] }
 0x28b   :  { %v2762_v25 = vsel %vm595_vm4, 1.0, %v2905_v11  ;;  %v2763_v58 = vsel %vm596_vm5, 1.0, %v2905_v11  ;;  %v1975_v59 = vunpack.c.l.b16 %v1365_v50  ;;  %v2841_v0 = vor.u32 %v2853_v37, %v2838_v46 }
 0x28c   :  { %2458 = vmatpush.bf16.msra.mxu2 %v2113_v38  ;;  %v2111_v13 = vpack.c.b16 %v1978_v52, %v1977_v32  ;;  %v1976_v14 = vunpack.c.l.b16 %v1366_v22  ;;  %v1363_v60 = vpack.c.bf16 %v2762_v25, %v2762_v25  ;;  %v1364_v61 = vpack.c.bf16 %v2763_v58, %v2763_v58 }
 0x28d   :  { %vm252_vm6 = vcmask 15360   ;;  %v2269_v26 = vadd.f32 %v2268_v2, %v2254_v40  ;;  %v2271_v27 = vadd.f32 %v2270_v24, %v2256_v45  ;;  %vm254_vm7 = vcmask 8192  }
 0x28e   :  { %v2110_v36 = vpack.c.b16 %v1976_v14, %v1975_v59  ;;  %v1973_v62 = vunpack.c.l.b16 %v1363_v60  ;;  %v1974_v43 = vunpack.c.l.b16 %v1364_v61  ;;  %v2296_v1 = vpop.f32.mrf.mxu2  ;;  %253 = vst.msk [vmem:[%s3951_s4] sm:$0xff] %vm252_vm6, %v2905_v11 }
 0x28f   :  { %v2310_v4 = vpop.f32.mrf.mxu3  ;;  %v2283_v20 = vadd.f32 %v2282_v7, %v2269_v26  ;;  %v2285_v29 = vadd.f32 %v2284_v3, %v2271_v27  ;;  %255 = vst.msk [vmem:[%s3951_s4 + $0x8] sm:$0x1] %vm254_vm7, %v2905_v11 }
 0x290   :  { %2459 = vmatpush.bf16.msra.mxu2 %v2112_v31  ;;  %v2109_v63 = vpack.c.b16 %v1974_v43, %v1973_v62 }
 0x291   :  { %v2297_v5 = vadd.f32 %v2296_v1, %v2283_v20 }
 0x293   :  { %v2311_v28 = vadd.f32 %v2310_v4, %v2297_v5 }
 0x294   :  { %2460 = vmatpush.bf16.msra.mxu2 %v2111_v13 }
 0x295   :  { %v2325_v30 = vadd.f32 %v2324_v47, %v2311_v28  ;;  %v1379_v60 = vld [vmem:[%s3951_s4] sm:$0xff] }
 0x296   :  { %v2298_v21 = vpop.f32.mrf.mxu2 }
 0x297   :  { %v2338_v44 = vpop.f32.mrf.mxu1  ;;  %v2312_v9 = vpop.f32.mrf.mxu3  ;;  %v2299_v19 = vadd.f32 %v2298_v21, %v2285_v29 }
 0x298   :  { %2461 = vmatpush.bf16.msra.mxu2 %v2110_v36  ;;  %v2339_v18 = vadd.f32 %v2338_v44, %v2325_v30 }
 0x299   :  { %v2313_v34 = vadd.f32 %v2312_v9, %v2299_v19 }
 0x29b   :  { %v2327_v51 = vadd.f32 %v2326_v17, %v2313_v34 }
 0x29c   :  { %2462 = vmatpush.bf16.msra.mxu2 %v2109_v63  ;;  %v1380_v63 = vld [vmem:[%s3951_s4 + $0x8] sm:$0x1] }
 0x29f   :  { %2463 = vmatmul.bf16.vlgmr.msra.gmra.mxu2 %v2841_v0  ;;  %v2340_v33 = vpop.f32.mrf.mxu1 }
 0x2a0   :  { %v2341_v56 = vadd.f32 %v2340_v33, %v2327_v51 }
 0x2cb   :  { %v2352_v15 = vpop.f32.mrf.mxu2 }
 0x2cc   :  { %v2353_v35 = vadd.f32 %v2352_v15, %v2339_v18 }
 0x2ce   :  { %v2366_v16 = vpop.f32.mrf.mxu3 }
 0x2cf   :  { %v2367_v54 = vadd.f32 %v2366_v16, %v2353_v35 }
 0x2d3   :  { %v2354_v41 = vpop.f32.mrf.mxu2 }
 0x2d4   :  { %v2355_v6 = vadd.f32 %v2354_v41, %v2341_v56 }
 0x2d6   :  { %v2380_v48 = vpop.f32.mrf.mxu0  ;;  %v2368_v55 = vpop.f32.mrf.mxu3 }
 0x2d7   :  { %v2381_v57 = vadd.f32 %v2380_v48, %v2367_v54  ;;  %v2369_v42 = vadd.f32 %v2368_v55, %v2355_v6 }
 0x2d9   :  { %v2394_v53 = vpop.f32.mrf.mxu1 }
 0x2da   :  { %v2395_v23 = vadd.f32 %v2394_v53, %v2381_v57 }
 0x2de   :  { %v2382_v8 = vpop.f32.mrf.mxu0 }
 0x2df   :  { %v2383_v39 = vadd.f32 %v2382_v8, %v2369_v42 }
 0x2e1   :  { %v2396_v10 = vpop.f32.mrf.mxu1 }
 0x2e2   :  { %v2397_v52 = vadd.f32 %v2396_v10, %v2383_v39 }
 0x2fe   :  { %v2436_v50 = vpop.f32.mrf.mxu0 }
 0x300   :  { %v2408_v38 = vpop.f32.mrf.mxu2 }
 0x301   :  { %v2409_v12 = vadd.f32 %v2408_v38, %v2395_v23 }
 0x302   :  { %v2450_v11 = vpop.f32.mrf.mxu1 }
 0x303   :  { %v2422_v49 = vpop.f32.mrf.mxu3 }
 0x304   :  { %v2423_v31 = vadd.f32 %v2422_v49, %v2409_v12 }
 0x306   :  { %v2437_v22 = vadd.f32 %v2436_v50, %v2423_v31  ;;  %v2438_v14 = vpop.f32.mrf.mxu0 }
 0x308   :  { %v2410_v32 = vpop.f32.mrf.mxu2  ;;  %v2451_v59 = vadd.f32 %v2450_v11, %v2437_v22 }
 0x309   :  { %v2411_v25 = vadd.f32 %v2410_v32, %v2397_v52 }
 0x30a   :  { %v2452_v37 = vpop.f32.mrf.mxu1 }
 0x30b   :  { %v2424_v58 = vpop.f32.mrf.mxu3 }
 0x30c   :  { %v2425_v13 = vadd.f32 %v2424_v58, %v2411_v25 }
 0x30e   :  { %v2439_v62 = vadd.f32 %v2438_v14, %v2425_v13 }
 0x310   :  { %v2453_v46 = vadd.f32 %v2452_v37, %v2439_v62 }
 0x322   :  { %v2464_v61 = vpop.f32.mrf.mxu2 }
 0x323   :  { %v2465_v36 = vadd.f32 %v2464_v61, %v2451_v59 }
 0x325   :  { %v2469_v43 = vadd.f32 %v2465_v36, %v1379_v60 }
 0x327   :  { %2472 = vst.msk [vmem:[%s3951_s4] sm:$0xff] %vm252_vm6, %v2469_v43 }
 0x32a   :  { %v2466_v0 = vpop.f32.mrf.mxu2 }
 0x32b   :  { %v2467_v40 = vadd.f32 %v2466_v0, %v2453_v46 }
 0x32d   :  { %v2470_v2 = vadd.f32 %v2467_v40, %v1380_v63 }
 0x32f   :  { %2474 = vst.msk [vmem:[%s3951_s4 + $0x8] sm:$0x1] %vm254_vm7, %v2470_v2 }
 0x330   :  { %2479 = vsyncpa [#allocation4], 1 }

</bundles_post_ra>
